<compile_context>
chip_gen: v6e
topology: v6e:2x2x1
jax: 0.10.0
libtpu: 0.0.40
codegen_flags: <defaults>
</compile_context>

<pallas_src>
import jax
import jax.numpy as jnp
from jax.experimental import pallas as pl
from jax.experimental.pallas import tpu as pltpu


# ---------------------------------------------------------------------------
# Indices of the 14 underlying Linear layers (weights stored (in, out)).
# ---------------------------------------------------------------------------
NW = 14
(W_SE,                                  # fc_state_encoder
 W_IH_R, W_IH_Z, W_IH_N,                # GRUCell input->hidden, per gate
 W_HH_R, W_HH_Z, W_HH_N,                # GRUCell hidden->hidden, per gate
 W_SD,                                  # fc_state_decoder
 W_AE1, W_AE2,                          # fc_action_encoder
 W_D1, W_D2, W_D3, W_D4) = range(NW)    # fc_dynamics


def _round_up(x, m):
    return (x + m - 1) // m * m


# ---------------------------------------------------------------------------
# Kernel
# ---------------------------------------------------------------------------
def forward_model_kernel(in_ref, wf_ref, wd_ref, b_ref, out_ref):
    f32 = jnp.float32
    wdt = wf_ref.dtype               # weights may be bf16; gate math stays f32
    P = wd_ref.shape[1]              # padded feature dim (multiple of 128)

    def sigmoid(x):
        # exp + approximate reciprocal both run on the EUP slot (co-issues next
        # to the MXU/VPU work).
        return pl.reciprocal(1.0 + jnp.exp(-x), approx=True)

    h = in_ref[:, 2 * P:3 * P]       # carried GRU state, f32 (tile_b, P)

    # ---- stage 1: [state | action] @ blockdiag(W_se, W_ae1) + bias, ReLU ----
    sa = in_ref[:, 0:2 * P].astype(wdt)
    y1 = jnp.maximum(
        jnp.dot(sa, wf_ref[:, 0:2 * P], preferred_element_type=f32)
        + b_ref[0:1, 0:2 * P], 0.0)
    x_enc = y1[:, 0:P]               # fc_state_encoder output (ReLU'd)
    a1 = y1[:, P:2 * P]              # fc_action_encoder hidden output (ReLU'd)

    # ---- GRUCell: one fused (tile_b, 2P) @ (2P, 4P) matmul ----
    # columns: [ W_ir x + W_hr h | W_iz x + W_hz h | W_in x | W_hn h ]
    xh = jnp.concatenate([x_enc, h], axis=1).astype(wdt)
    g = (jnp.dot(xh, wf_ref[:, 2 * P:6 * P], preferred_element_type=f32)
         + b_ref[1:2, :])
    r = sigmoid(g[:, 0:P])
    z = sigmoid(g[:, P:2 * P])
    n = jnp.tanh(g[:, 2 * P:3 * P] + r * g[:, 3 * P:4 * P])
    h_new = n + z * (h - n)          # == (1 - z) * n + z * h  (PyTorch GRUCell)

    # ---- stage 3: [h_new | a1] @ blockdiag(W_sd, W_ae2) + bias, Sigmoid ----
    ha = jnp.concatenate([h_new, a1], axis=1).astype(wdt)
    y3 = sigmoid(
        jnp.dot(ha, wf_ref[:, 6 * P:8 * P], preferred_element_type=f32)
        + b_ref[2:3, 0:2 * P])
    joint = y3[:, 0:P] * y3[:, P:2 * P]   # encoded_state * encoded_action

    # ---- fc_dynamics: 3x (Linear + ReLU) + Linear (genuinely serial) ----
    d = joint
    for i in range(3):
        d = jnp.maximum(
            jnp.dot(d.astype(wdt), wd_ref[i], preferred_element_type=f32)
            + b_ref[3 + i:4 + i, 0:P], 0.0)
    nxt = (jnp.dot(d.astype(wdt), wd_ref[3], preferred_element_type=f32)
           + b_ref[6:7, 0:P])

    # Packed, lane-dense output: [next_state | h_new], both 128-lane aligned.
    out_ref[:, 0:P] = nxt.astype(out_ref.dtype)
    out_ref[:, P:2 * P] = h_new.astype(out_ref.dtype)


# ---------------------------------------------------------------------------
# Parameter construction / packing
# ---------------------------------------------------------------------------
def init_params(key, state_size, action_size, encoding_size):
    """Deterministic synthetic parameters: {idx: (w (in,out), b (out,))} in f32.

    (common.init_weights from the original repo is replaced by this synthetic
    initializer; the forward math is unchanged.)
    """
    dims = {
        W_SE:   (state_size, encoding_size),
        W_IH_R: (encoding_size, encoding_size),
        W_IH_Z: (encoding_size, encoding_size),
        W_IH_N: (encoding_size, encoding_size),
        W_HH_R: (encoding_size, encoding_size),
        W_HH_Z: (encoding_size, encoding_size),
        W_HH_N: (encoding_size, encoding_size),
        W_SD:   (encoding_size, encoding_size),
        W_AE1:  (action_size, encoding_size),
        W_AE2:  (encoding_size, encoding_size),
        W_D1:   (encoding_size, encoding_size),
        W_D2:   (encoding_size, encoding_size),
        W_D3:   (encoding_size, encoding_size),
        W_D4:   (encoding_size, state_size),
    }
    keys = jax.random.split(key, NW)
    params = {}
    for i in range(NW):
        fi, fo = dims[i]
        kw, kb = jax.random.split(keys[i])
        scale = 1.0 / jnp.sqrt(jnp.float32(fi))
        w = jax.random.normal(kw, (fi, fo), jnp.float32) * scale
        b = jax.random.normal(kb, (fo,), jnp.float32) * 0.01
        params[i] = (w, b)
    return params


def pack_params(params, w_dtype=jnp.float32):
    """Pack the 14 Linear layers into fused, 128-lane-padded slabs.

    Returns:
      w_fused:  (2P, 8P) = [blockdiag(W_se,W_ae1) | W_gru (2P,4P) | blockdiag(W_sd,W_ae2)]
      w_dyn:    (4, P, P) fc_dynamics layers
      b_packed: (8, 4P)   f32 bias rows (layout matches the kernel)
    bf16 weights are valid on v5e/v6e/v7x (MXU is bf16-native everywhere);
    biases and all elementwise gate math stay f32.
    """
    max_dim = 0
    for w, _ in params.values():
        max_dim = max(max_dim, w.shape[0], w.shape[1])
    P = _round_up(max_dim, 128)
    z = jnp.zeros((P, P), jnp.float32)

    def pw(i):
        w, _ = params[i]
        return z.at[:w.shape[0], :w.shape[1]].set(w)

    def pb(i):
        _, b = params[i]
        return jnp.zeros((P,), jnp.float32).at[:b.shape[0]].set(b)

    w1 = jnp.block([[pw(W_SE), z], [z, pw(W_AE1)]])                    # (2P, 2P)
    wg = jnp.block([[pw(W_IH_R), pw(W_IH_Z), pw(W_IH_N), z],
                    [pw(W_HH_R), pw(W_HH_Z), z, pw(W_HH_N)]])          # (2P, 4P)
    w3 = jnp.block([[pw(W_SD), z], [z, pw(W_AE2)]])                    # (2P, 2P)
    w_fused = jnp.concatenate([w1, wg, w3], axis=1).astype(w_dtype)    # (2P, 8P)
    w_dyn = jnp.stack([pw(W_D1), pw(W_D2), pw(W_D3), pw(W_D4)]).astype(w_dtype)

    b_packed = jnp.zeros((8, 4 * P), jnp.float32)
    b_packed = b_packed.at[0, 0:P].set(pb(W_SE))
    b_packed = b_packed.at[0, P:2 * P].set(pb(W_AE1))
    b_packed = b_packed.at[1, 0:P].set(pb(W_IH_R) + pb(W_HH_R))        # b_ir + b_hr
    b_packed = b_packed.at[1, P:2 * P].set(pb(W_IH_Z) + pb(W_HH_Z))    # b_iz + b_hz
    b_packed = b_packed.at[1, 2 * P:3 * P].set(pb(W_IH_N))             # b_in
    b_packed = b_packed.at[1, 3 * P:4 * P].set(pb(W_HH_N))             # b_hn (inside r*(...))
    b_packed = b_packed.at[2, 0:P].set(pb(W_SD))
    b_packed = b_packed.at[2, P:2 * P].set(pb(W_AE2))
    b_packed = b_packed.at[3, 0:P].set(pb(W_D1))
    b_packed = b_packed.at[4, 0:P].set(pb(W_D2))
    b_packed = b_packed.at[5, 0:P].set(pb(W_D3))
    b_packed = b_packed.at[6, 0:P].set(pb(W_D4))
    return w_fused, w_dyn, b_packed


# ---------------------------------------------------------------------------
# Wrapper
# ---------------------------------------------------------------------------
@jax.jit
def forward_model(state, action, gru_state, w_fused, w_dyn, b_packed):
    B, S = state.shape
    A = action.shape[1]
    E = gru_state.shape[1]
    P = w_dyn.shape[1]
    f32 = jnp.float32

    # Batch tile: one tile up to 512 rows (amortizes the ~0.35us/step pipeline
    # overhead); above that, tile at 512 so the 'parallel' batch axis yields
    # >= 2 tiles to shard across v7x's two TensorCores.  bf16 weights round the
    # small-batch tile to 16 rows (bf16 sublane packing of the dot operands).
    sub = 16 if w_fused.dtype == jnp.bfloat16 else 8
    tile_b = 512 if B > 512 else _round_up(max(B, 1), sub)
    pB = _round_up(B, tile_b)

    # Single packed, lane-dense input slab: [state | action | h], zero-padded.
    # (Zero padding keeps the padded matmul math exact.)
    state_p = jnp.pad(state.astype(f32), ((0, pB - B), (0, P - S)))
    action_p = jnp.pad(action.astype(f32), ((0, pB - B), (0, P - A)))
    h_p = jnp.pad(gru_state.astype(f32), ((0, pB - B), (0, P - E)))
    packed_in = jnp.concatenate([state_p, action_p, h_p], axis=1)      # (pB, 3P)

    out = pl.pallas_call(
        forward_model_kernel,
        out_shape=jax.ShapeDtypeStruct((pB, 2 * P), f32),
        grid=(pB // tile_b,),
        in_specs=[
            pl.BlockSpec((tile_b, 3 * P), lambda i: (i, 0)),
            pl.BlockSpec(w_fused.shape, lambda i: (0, 0)),      # resident weights
            pl.BlockSpec(w_dyn.shape, lambda i: (0, 0, 0)),     # resident weights
            pl.BlockSpec(b_packed.shape, lambda i: (0, 0)),     # resident biases
        ],
        out_specs=pl.BlockSpec((tile_b, 2 * P), lambda i: (i, 0)),
        compiler_params=pltpu.CompilerParams(
            dimension_semantics=("parallel",)),
    )(packed_in, w_fused, w_dyn, b_packed)

    return out[:B, 0:S], out[:B, P:P + E]


# ---------------------------------------------------------------------------
# Pure-JAX reference (PyTorch semantics)
# ---------------------------------------------------------------------------
def forward_model_ref(state, action, gru_state, params):
    def lin(x, i):
        w, b = params[i]
        return x @ w + b

    sig = jax.nn.sigmoid
    x = jax.nn.relu(lin(state, W_SE))
    r = sig(lin(x, W_IH_R) + lin(gru_state, W_HH_R))
    z = sig(lin(x, W_IH_Z) + lin(gru_state, W_HH_Z))
    n = jnp.tanh(lin(x, W_IH_N) + r * lin(gru_state, W_HH_N))
    h_new = (1 - z) * n + z * gru_state
    enc_state = sig(lin(h_new, W_SD))
    a1 = jax.nn.relu(lin(action, W_AE1))
    enc_action = sig(lin(a1, W_AE2))
    joint = enc_state * enc_action
    d = jax.nn.relu(lin(joint, W_D1))
    d = jax.nn.relu(lin(d, W_D2))
    d = jax.nn.relu(lin(d, W_D3))
    next_state = lin(d, W_D4)
    return next_state, h_new


if __name__ == "__main__":
    STATE_SIZE = 16
    ACTION_SIZE = 8
    ENCODING_SIZE = 32
    BATCH = 8

    key = jax.random.PRNGKey(0)
    k_params, k_s, k_a, k_h = jax.random.split(key, 4)
    params = init_params(k_params, STATE_SIZE, ACTION_SIZE, ENCODING_SIZE)

    state = jax.random.normal(k_s, (BATCH, STATE_SIZE), jnp.float32)
    action = jax.random.normal(k_a, (BATCH, ACTION_SIZE), jnp.float32)
    gru_state = jax.random.normal(k_h, (BATCH, ENCODING_SIZE), jnp.float32)

    ref_next, ref_gru = forward_model_ref(state, action, gru_state, params)

    # f32 weights (approx-EUP sigmoid => tolerance looser than exact f32).
    w32, wd32, b32 = pack_params(params, w_dtype=jnp.float32)
    next_state, gru_new = forward_model(state, action, gru_state, w32, wd32, b32)
    jax.block_until_ready((next_state, gru_new))
    assert next_state.shape == (BATCH, STATE_SIZE)
    assert gru_new.shape == (BATCH, ENCODING_SIZE)
    assert jnp.allclose(next_state, ref_next, atol=3e-2, rtol=3e-2)
    assert jnp.allclose(gru_new, ref_gru, atol=3e-2, rtol=3e-2)

    # bf16 weights (MXU-native on v5e/v6e/v7x): loose check vs f32 reference.
    wbf, wdbf, bbf = pack_params(params, w_dtype=jnp.bfloat16)
    next_bf, gru_bf = forward_model(state, action, gru_state, wbf, wdbf, bbf)
    jax.block_until_ready((next_bf, gru_bf))
    assert jnp.allclose(next_bf, ref_next, atol=6e-2, rtol=6e-2)
    assert jnp.allclose(gru_bf, ref_gru, atol=6e-2, rtol=6e-2)

    print("KERNEL_OK")
</pallas_src>

<mosaic_0001>
module attributes {stable_mosaic.version = 11 : i64} {
  func.func @forward_model_kernel(%arg0: i32, %arg1: memref<8x384xf32, #tpu.memory_space<vmem>>, %arg2: memref<256x1024xf32, #tpu.memory_space<vmem>>, %arg3: memref<4x128x128xf32, #tpu.memory_space<vmem>>, %arg4: memref<8x512xf32, #tpu.memory_space<vmem>>, %arg5: memref<8x256xf32, #tpu.memory_space<vmem>>) attributes {dimension_semantics = [#tpu.dimension_semantics<parallel>], iteration_bounds = array<i64: 1>, scalar_prefetch = 0 : i64, scratch_operands = 0 : i64, tpu.core_type = #tpu.core_type<tc>, window_params = [{transform_indices = @transform_0, window_bounds = array<i64: 8, 384>}, {pipeline_mode = #tpu.pipeline_mode<synchronous>, transform_indices = @transform_1, window_bounds = array<i64: 256, 1024>}, {pipeline_mode = #tpu.pipeline_mode<synchronous>, transform_indices = @transform_2, window_bounds = array<i64: 4, 128, 128>}, {pipeline_mode = #tpu.pipeline_mode<synchronous>, transform_indices = @transform_3, window_bounds = array<i64: 8, 512>}, {transform_indices = @transform_4, window_bounds = array<i64: 8, 256>}]} {
    %c0 = arith.constant 0 : index
    %c256 = arith.constant 256 : index
    %0 = vector.load %arg1[%c0, %c256] : memref<8x384xf32, #tpu.memory_space<vmem>>, vector<8x128xf32>
    %c0_0 = arith.constant 0 : index
    %c0_1 = arith.constant 0 : index
    %1 = vector.load %arg1[%c0_0, %c0_1] : memref<8x384xf32, #tpu.memory_space<vmem>>, vector<8x256xf32>
    %c0_2 = arith.constant 0 : index
    %c0_3 = arith.constant 0 : index
    %2 = vector.load %arg2[%c0_2, %c0_3] : memref<256x1024xf32, #tpu.memory_space<vmem>>, vector<256x256xf32>
    %cst = arith.constant dense<0.000000e+00> : vector<8x256xf32>
    %3 = tpu.matmul %1, %2, %cst {dimension_numbers = #tpu.dot_dimension_numbers<[1], [0], [0], [1], [0, 0, 1, 1], [], []>} : vector<8x256xf32>, vector<256x256xf32>, vector<8x256xf32> -> vector<8x256xf32>
    %c0_4 = arith.constant 0 : index
    %c0_5 = arith.constant 0 : index
    %4 = vector.load %arg4[%c0_4, %c0_5] : memref<8x512xf32, #tpu.memory_space<vmem>>, vector<1x256xf32>
    %5 = vector.broadcast %4 : vector<1x256xf32> to vector<8x256xf32>
    %6 = arith.addf %3, %5 : vector<8x256xf32>
    %cst_6 = arith.constant 0.000000e+00 : f32
    %7 = vector.broadcast %cst_6 : f32 to vector<8x256xf32>
    %8 = arith.maximumf %6, %7 : vector<8x256xf32>
    %9 = vector.extract_strided_slice %8 {offsets = [0, 0], sizes = [8, 128], strides = [1, 1]} : vector<8x256xf32> to vector<8x128xf32>
    %10 = vector.extract_strided_slice %8 {offsets = [0, 128], sizes = [8, 128], strides = [1, 1]} : vector<8x256xf32> to vector<8x128xf32>
    %11 = tpu.concatenate %9, %0 in 1 : vector<8x128xf32>, vector<8x128xf32> -> vector<8x256xf32>
    %c0_7 = arith.constant 0 : index
    %c256_8 = arith.constant 256 : index
    %12 = vector.load %arg2[%c0_7, %c256_8] : memref<256x1024xf32, #tpu.memory_space<vmem>>, vector<256x512xf32>
    %cst_9 = arith.constant dense<0.000000e+00> : vector<8x512xf32>
    %13 = tpu.matmul %11, %12, %cst_9 {dimension_numbers = #tpu.dot_dimension_numbers<[1], [0], [0], [1], [0, 0, 1, 1], [], []>} : vector<8x256xf32>, vector<256x512xf32>, vector<8x512xf32> -> vector<8x512xf32>
    %c1 = arith.constant 1 : index
    %c0_10 = arith.constant 0 : index
    %14 = vector.load %arg4[%c1, %c0_10] : memref<8x512xf32, #tpu.memory_space<vmem>>, vector<1x512xf32>
    %15 = vector.broadcast %14 : vector<1x512xf32> to vector<8x512xf32>
    %16 = arith.addf %13, %15 : vector<8x512xf32>
    %17 = vector.extract_strided_slice %16 {offsets = [0, 0], sizes = [8, 128], strides = [1, 1]} : vector<8x512xf32> to vector<8x128xf32>
    %cst_11 = arith.constant 0.000000e+00 : f32
    %18 = vector.broadcast %cst_11 : f32 to vector<8x128xf32>
    %19 = arith.subf %18, %17 : vector<8x128xf32>
    %20 = math.exp %19 : vector<8x128xf32>
    %cst_12 = arith.constant 1.000000e+00 : f32
    %21 = vector.broadcast %cst_12 : f32 to vector<8x128xf32>
    %22 = arith.addf %21, %20 : vector<8x128xf32>
    %23 = tpu.reciprocal %22 {approx = true} : vector<8x128xf32> -> vector<8x128xf32>
    %24 = vector.extract_strided_slice %16 {offsets = [0, 128], sizes = [8, 128], strides = [1, 1]} : vector<8x512xf32> to vector<8x128xf32>
    %cst_13 = arith.constant 0.000000e+00 : f32
    %25 = vector.broadcast %cst_13 : f32 to vector<8x128xf32>
    %26 = arith.subf %25, %24 : vector<8x128xf32>
    %27 = math.exp %26 : vector<8x128xf32>
    %cst_14 = arith.constant 1.000000e+00 : f32
    %28 = vector.broadcast %cst_14 : f32 to vector<8x128xf32>
    %29 = arith.addf %28, %27 : vector<8x128xf32>
    %30 = tpu.reciprocal %29 {approx = true} : vector<8x128xf32> -> vector<8x128xf32>
    %31 = vector.extract_strided_slice %16 {offsets = [0, 256], sizes = [8, 128], strides = [1, 1]} : vector<8x512xf32> to vector<8x128xf32>
    %32 = vector.extract_strided_slice %16 {offsets = [0, 384], sizes = [8, 128], strides = [1, 1]} : vector<8x512xf32> to vector<8x128xf32>
    %33 = arith.mulf %23, %32 : vector<8x128xf32>
    %34 = arith.addf %31, %33 : vector<8x128xf32>
    %35 = math.tanh %34 : vector<8x128xf32>
    %36 = arith.subf %0, %35 : vector<8x128xf32>
    %37 = arith.mulf %30, %36 : vector<8x128xf32>
    %38 = arith.addf %35, %37 : vector<8x128xf32>
    %39 = tpu.concatenate %38, %10 in 1 : vector<8x128xf32>, vector<8x128xf32> -> vector<8x256xf32>
    %c0_15 = arith.constant 0 : index
    %c768 = arith.constant 768 : index
    %40 = vector.load %arg2[%c0_15, %c768] : memref<256x1024xf32, #tpu.memory_space<vmem>>, vector<256x256xf32>
    %cst_16 = arith.constant dense<0.000000e+00> : vector<8x256xf32>
    %41 = tpu.matmul %39, %40, %cst_16 {dimension_numbers = #tpu.dot_dimension_numbers<[1], [0], [0], [1], [0, 0, 1, 1], [], []>} : vector<8x256xf32>, vector<256x256xf32>, vector<8x256xf32> -> vector<8x256xf32>
    %c2 = arith.constant 2 : index
    %c0_17 = arith.constant 0 : index
    %42 = vector.load %arg4[%c2, %c0_17] : memref<8x512xf32, #tpu.memory_space<vmem>>, vector<1x256xf32>
    %43 = vector.broadcast %42 : vector<1x256xf32> to vector<8x256xf32>
    %44 = arith.addf %41, %43 : vector<8x256xf32>
    %cst_18 = arith.constant 0.000000e+00 : f32
    %45 = vector.broadcast %cst_18 : f32 to vector<8x256xf32>
    %46 = arith.subf %45, %44 : vector<8x256xf32>
    %47 = math.exp %46 : vector<8x256xf32>
    %cst_19 = arith.constant 1.000000e+00 : f32
    %48 = vector.broadcast %cst_19 : f32 to vector<8x256xf32>
    %49 = arith.addf %48, %47 : vector<8x256xf32>
    %50 = tpu.reciprocal %49 {approx = true} : vector<8x256xf32> -> vector<8x256xf32>
    %51 = vector.extract_strided_slice %50 {offsets = [0, 0], sizes = [8, 128], strides = [1, 1]} : vector<8x256xf32> to vector<8x128xf32>
    %52 = vector.extract_strided_slice %50 {offsets = [0, 128], sizes = [8, 128], strides = [1, 1]} : vector<8x256xf32> to vector<8x128xf32>
    %53 = arith.mulf %51, %52 : vector<8x128xf32>
    %c0_20 = arith.constant 0 : index
    %c0_21 = arith.constant 0 : index
    %c0_22 = arith.constant 0 : index
    %54 = vector.load %arg3[%c0_20, %c0_21, %c0_22] : memref<4x128x128xf32, #tpu.memory_space<vmem>>, vector<1x128x128xf32>
    %55 = vector.shape_cast %54 : vector<1x128x128xf32> to vector<128x128xf32>
    %cst_23 = arith.constant dense<0.000000e+00> : vector<8x128xf32>
    %56 = tpu.matmul %53, %55, %cst_23 {dimension_numbers = #tpu.dot_dimension_numbers<[1], [0], [0], [1], [0, 0, 1, 1], [], []>} : vector<8x128xf32>, vector<128x128xf32>, vector<8x128xf32> -> vector<8x128xf32>
    %c3 = arith.constant 3 : index
    %c0_24 = arith.constant 0 : index
    %57 = vector.load %arg4[%c3, %c0_24] : memref<8x512xf32, #tpu.memory_space<vmem>>, vector<1x128xf32>
    %58 = vector.broadcast %57 : vector<1x128xf32> to vector<8x128xf32>
    %59 = arith.addf %56, %58 : vector<8x128xf32>
    %cst_25 = arith.constant 0.000000e+00 : f32
    %60 = vector.broadcast %cst_25 : f32 to vector<8x128xf32>
    %61 = arith.maximumf %59, %60 : vector<8x128xf32>
    %c1_26 = arith.constant 1 : index
    %c0_27 = arith.constant 0 : index
    %c0_28 = arith.constant 0 : index
    %62 = vector.load %arg3[%c1_26, %c0_27, %c0_28] : memref<4x128x128xf32, #tpu.memory_space<vmem>>, vector<1x128x128xf32>
    %63 = vector.shape_cast %62 : vector<1x128x128xf32> to vector<128x128xf32>
    %cst_29 = arith.constant dense<0.000000e+00> : vector<8x128xf32>
    %64 = tpu.matmul %61, %63, %cst_29 {dimension_numbers = #tpu.dot_dimension_numbers<[1], [0], [0], [1], [0, 0, 1, 1], [], []>} : vector<8x128xf32>, vector<128x128xf32>, vector<8x128xf32> -> vector<8x128xf32>
    %c4 = arith.constant 4 : index
    %c0_30 = arith.constant 0 : index
    %65 = vector.load %arg4[%c4, %c0_30] : memref<8x512xf32, #tpu.memory_space<vmem>>, vector<1x128xf32>
    %66 = vector.broadcast %65 : vector<1x128xf32> to vector<8x128xf32>
    %67 = arith.addf %64, %66 : vector<8x128xf32>
    %cst_31 = arith.constant 0.000000e+00 : f32
    %68 = vector.broadcast %cst_31 : f32 to vector<8x128xf32>
    %69 = arith.maximumf %67, %68 : vector<8x128xf32>
    %c2_32 = arith.constant 2 : index
    %c0_33 = arith.constant 0 : index
    %c0_34 = arith.constant 0 : index
    %70 = vector.load %arg3[%c2_32, %c0_33, %c0_34] : memref<4x128x128xf32, #tpu.memory_space<vmem>>, vector<1x128x128xf32>
    %71 = vector.shape_cast %70 : vector<1x128x128xf32> to vector<128x128xf32>
    %cst_35 = arith.constant dense<0.000000e+00> : vector<8x128xf32>
    %72 = tpu.matmul %69, %71, %cst_35 {dimension_numbers = #tpu.dot_dimension_numbers<[1], [0], [0], [1], [0, 0, 1, 1], [], []>} : vector<8x128xf32>, vector<128x128xf32>, vector<8x128xf32> -> vector<8x128xf32>
    %c5 = arith.constant 5 : index
    %c0_36 = arith.constant 0 : index
    %73 = vector.load %arg4[%c5, %c0_36] : memref<8x512xf32, #tpu.memory_space<vmem>>, vector<1x128xf32>
    %74 = vector.broadcast %73 : vector<1x128xf32> to vector<8x128xf32>
    %75 = arith.addf %72, %74 : vector<8x128xf32>
    %cst_37 = arith.constant 0.000000e+00 : f32
    %76 = vector.broadcast %cst_37 : f32 to vector<8x128xf32>
    %77 = arith.maximumf %75, %76 : vector<8x128xf32>
    %c3_38 = arith.constant 3 : index
    %c0_39 = arith.constant 0 : index
    %c0_40 = arith.constant 0 : index
    %78 = vector.load %arg3[%c3_38, %c0_39, %c0_40] : memref<4x128x128xf32, #tpu.memory_space<vmem>>, vector<1x128x128xf32>
    %79 = vector.shape_cast %78 : vector<1x128x128xf32> to vector<128x128xf32>
    %cst_41 = arith.constant dense<0.000000e+00> : vector<8x128xf32>
    %80 = tpu.matmul %77, %79, %cst_41 {dimension_numbers = #tpu.dot_dimension_numbers<[1], [0], [0], [1], [0, 0, 1, 1], [], []>} : vector<8x128xf32>, vector<128x128xf32>, vector<8x128xf32> -> vector<8x128xf32>
    %c6 = arith.constant 6 : index
    %c0_42 = arith.constant 0 : index
    %81 = vector.load %arg4[%c6, %c0_42] : memref<8x512xf32, #tpu.memory_space<vmem>>, vector<1x128xf32>
    %82 = vector.broadcast %81 : vector<1x128xf32> to vector<8x128xf32>
    %83 = arith.addf %80, %82 : vector<8x128xf32>
    %c0_43 = arith.constant 0 : index
    %c0_44 = arith.constant 0 : index
    %84 = vector.load %arg5[%c0_43, %c0_44] : memref<8x256xf32, #tpu.memory_space<vmem>>, vector<8x128xf32>
    tpu.vector_store %arg5[%c0_43, %c0_44], %83 {strides = array<i32>} : memref<8x256xf32, #tpu.memory_space<vmem>>, vector<8x128xf32>,
    %c0_45 = arith.constant 0 : index
    %c128 = arith.constant 128 : index
    %85 = vector.load %arg5[%c0_45, %c128] : memref<8x256xf32, #tpu.memory_space<vmem>>, vector<8x128xf32>
    tpu.vector_store %arg5[%c0_45, %c128], %38 {strides = array<i32>} : memref<8x256xf32, #tpu.memory_space<vmem>>, vector<8x128xf32>,
    return
  }
  func.func @transform_0(%arg0: i32) -> (i32, i32) {
    %c0_i32 = arith.constant 0 : i32
    %c0_i32_0 = arith.constant 0 : i32
    return %arg0, %c0_i32 : i32, i32
  }
  func.func @transform_1(%arg0: i32) -> (i32, i32) {
    %c0_i32 = arith.constant 0 : i32
    %c0_i32_0 = arith.constant 0 : i32
    %c0_i32_1 = arith.constant 0 : i32
    return %c0_i32, %c0_i32_0 : i32, i32
  }
  func.func @transform_2(%arg0: i32) -> (i32, i32, i32) {
    %c0_i32 = arith.constant 0 : i32
    %c0_i32_0 = arith.constant 0 : i32
    %c0_i32_1 = arith.constant 0 : i32
    %c0_i32_2 = arith.constant 0 : i32
    return %c0_i32, %c0_i32_0, %c0_i32_1 : i32, i32, i32
  }
  func.func @transform_3(%arg0: i32) -> (i32, i32) {
    %c0_i32 = arith.constant 0 : i32
    %c0_i32_0 = arith.constant 0 : i32
    %c0_i32_1 = arith.constant 0 : i32
    return %c0_i32, %c0_i32_0 : i32, i32
  }
  func.func @transform_4(%arg0: i32) -> (i32, i32) {
    %c0_i32 = arith.constant 0 : i32
    %c0_i32_0 = arith.constant 0 : i32
    return %arg0, %c0_i32 : i32, i32
  }
}

</mosaic_0001>

<bundles_post_ra>
// kernel: forward_model.1
= control target key start
LH: loop header
LB: loop body
LE: loop exit
PB: predicated region body
PF: predicated region fallthrough
CT: control target
= control target key end

     0   :  { %9 = vsyncpa [#allocation3], 0  ;;  %s1475_s0 = inlined_call_operand.vmem [shape: f32[8,384], index: 0, kind: input, shape index: {}]   ;;  %s1476_s1 = inlined_call_operand.hbm [shape: f32[256,1024], index: 1, kind: input, shape index: {}]   ;;  %s1477_s2 = inlined_call_operand.hbm [shape: f32[4,128,128], index: 2, kind: input, shape index: {}]   ;;  %s1478_s3 = inlined_call_operand.vmem [shape: f32[8,512], index: 3, kind: input, shape index: {}]   ;;  %s1479_s4 = inlined_call_operand.vmem [shape: f32[8,256], index: 4, kind: output, shape index: {}]  }
   0x1   :  { %10 = vsyncpa [#allocation5], 0  ;;  %s1307_s15 = smov [#allocation2]  }
   0x2   :  { %s18_s16 = sshll.u32 %s1307_s15, 4  ;;  %s19_s16 = int_to_ptr.vmem [resolvable:$true] %s18_s16 }
   0x3   :  { %s1271_s17 = scalar_lea.vmem %s19_s16, 32768  ;;  %p1276_p1 = scmp.lt.s32.totalorder %s19_s16, %s19_s16 }
   0x4   :  { %p1272_p0 = scmp.ne.s32.totalorder %s19_s16, %s1271_s17  ;;  %p1277_p2 = scmp.lt.s32.totalorder %s1271_s17, %s1271_s17 }
   0x6   :  { %p1278_p3 = por %p1277_p2, %p1276_p1 }
   0x8   :  { %p1279_p4 = pnand %p1278_p3, %p1272_p0 }
   0xa   :  { %1282 = shalt.err (!%p1279_p4)
}
   0xb   :  { %s1308_s18 = smov 1024   ;;  %s1309_s19 = smov 64  }
   0xc   :  { %24 = dma.hbm_to_vmem [thread:$0]  %s1476_s1, 32768, %s19_s16, [#allocation3], %s1308_s18, %s1308_s18, %s1309_s19  }
   0xd   :  { %s1310_s22 = smov [#allocation4]  }
   0xe   :  { %s30_s23 = sshll.u32 %s1310_s22, 4  ;;  %s31_s23 = int_to_ptr.vmem [resolvable:$true] %s30_s23 }
   0xf   :  { %s1291_s24 = scalar_lea.vmem %s31_s23, 8192  ;;  %p1296_p6 = scmp.lt.s32.totalorder %s31_s23, %s31_s23 }
  0x10   :  { %p1292_p5 = scmp.ne.s32.totalorder %s31_s23, %s1291_s24  ;;  %p1297_p7 = scmp.lt.s32.totalorder %s1291_s24, %s1291_s24 }
  0x12   :  { %p1298_p8 = por %p1297_p7, %p1296_p6 }
  0x14   :  { %p1299_p9 = pnand %p1298_p8, %p1292_p5 }
  0x16   :  { %1302 = shalt.err (!%p1299_p9)
}
  0x17   :  { %s1311_s25 = smov 128   ;;  %s1312_s26 = smov 8  }
  0x18   :  { %36 = dma.hbm_to_vmem [thread:$0]  %s1477_s2, 8192, %s31_s23, [#allocation5], %s1311_s25, %s1311_s25, %s1312_s26  }
  0x19   :  { %1303 = dma.done.wait [#allocation3], 32768  }
  0x1a   :  { %1304 = vsyncadd [#allocation3], 4294934528 }
  0x1b   :  { %1305 = dma.done.wait [#allocation5], 8192  }
  0x1c   :  { %1306 = vsyncadd [#allocation5], 4294959104  ;;  %v79_v0 = vld [vmem:[#allocation2 + $0x3c8] sm:$0xff]  ;;  %v78_v1 = vld [vmem:[#allocation2 + $0x3c0] sm:$0xff]  ;;  %vm1314_vm0 = vmmov 0  }
  0x1d   :  { %v77_v2 = vld [vmem:[#allocation2 + $0x388] sm:$0xff]  ;;  %124 = vmatprep.subr.mxu0 %v79_v0  ;;  %v76_v3 = vld [vmem:[#allocation2 + $0x380] sm:$0xff]  ;;  %v258_v26 = vld [vmem:[#allocation2 + $0x3d8] sm:$0xff] }
  0x1e   :  { %125 = vmatpush1.msra.mxu0 %v78_v1  ;;  %v75_v4 = vld [vmem:[#allocation2 + $0x348] sm:$0xff]  ;;  %v74_v5 = vld [vmem:[#allocation2 + $0x340] sm:$0xff]  ;;  %v257_v27 = vld [vmem:[#allocation2 + $0x3d0] sm:$0xff]  ;;  %348 = vmatprep.subr.mxu1 %v258_v26 }
  0x1f   :  { %126 = vmatprep.subr.mxu0 %v77_v2  ;;  %v73_v6 = vld [vmem:[#allocation2 + $0x308] sm:$0xff]  ;;  %v72_v7 = vld [vmem:[#allocation2 + $0x300] sm:$0xff]  ;;  %v254_v29 = vld [vmem:[#allocation2 + $0x398] sm:$0xff]  ;;  %349 = vmatpush1.msra.mxu1 %v257_v27 }
  0x20   :  { %127 = vmatpush1.msra.mxu0 %v76_v3  ;;  %v71_v8 = vld [vmem:[#allocation2 + $0x2c8] sm:$0xff]  ;;  %v70_v9 = vld [vmem:[#allocation2 + $0x2c0] sm:$0xff]  ;;  %v253_v31 = vld [vmem:[#allocation2 + $0x390] sm:$0xff]  ;;  %350 = vmatprep.subr.mxu1 %v254_v29 }
  0x21   :  { %128 = vmatprep.subr.mxu0 %v75_v4  ;;  %v69_v10 = vld [vmem:[#allocation2 + $0x288] sm:$0xff]  ;;  %v68_v11 = vld [vmem:[#allocation2 + $0x280] sm:$0xff]  ;;  %v250_v32 = vld [vmem:[#allocation2 + $0x358] sm:$0xff]  ;;  %351 = vmatpush1.msra.mxu1 %v253_v31 }
  0x22   :  { %129 = vmatpush1.msra.mxu0 %v74_v5  ;;  %v67_v12 = vld [vmem:[#allocation2 + $0x248] sm:$0xff]  ;;  %v66_v13 = vld [vmem:[#allocation2 + $0x240] sm:$0xff]  ;;  %v249_v34 = vld [vmem:[#allocation2 + $0x350] sm:$0xff]  ;;  %352 = vmatprep.subr.mxu1 %v250_v32 }
  0x23   :  { %130 = vmatprep.subr.mxu0 %v73_v6  ;;  %v65_v14 = vld [vmem:[#allocation2 + $0x208] sm:$0xff]  ;;  %v64_v15 = vld [vmem:[#allocation2 + $0x200] sm:$0xff]  ;;  %v246_v36 = vld [vmem:[#allocation2 + $0x318] sm:$0xff]  ;;  %353 = vmatpush1.msra.mxu1 %v249_v34 }
  0x24   :  { %131 = vmatpush1.msra.mxu0 %v72_v7  ;;  %v63_v16 = vld [vmem:[#allocation2 + $0x1c8] sm:$0xff]  ;;  %v62_v17 = vld [vmem:[#allocation2 + $0x1c0] sm:$0xff]  ;;  %v245_v38 = vld [vmem:[#allocation2 + $0x310] sm:$0xff]  ;;  %354 = vmatprep.subr.mxu1 %v246_v36 }
  0x25   :  { %132 = vmatprep.subr.mxu0 %v71_v8  ;;  %v61_v18 = vld [vmem:[#allocation2 + $0x188] sm:$0xff]  ;;  %v60_v19 = vld [vmem:[#allocation2 + $0x180] sm:$0xff]  ;;  %v242_v40 = vld [vmem:[#allocation2 + $0x2d8] sm:$0xff]  ;;  %355 = vmatpush1.msra.mxu1 %v245_v38 }
  0x26   :  { %133 = vmatpush1.msra.mxu0 %v70_v9  ;;  %v59_v20 = vld [vmem:[#allocation2 + $0x148] sm:$0xff]  ;;  %v58_v21 = vld [vmem:[#allocation2 + $0x140] sm:$0xff]  ;;  %v241_v42 = vld [vmem:[#allocation2 + $0x2d0] sm:$0xff]  ;;  %356 = vmatprep.subr.mxu1 %v242_v40 }
  0x27   :  { %134 = vmatprep.subr.mxu0 %v69_v10  ;;  %v57_v22 = vld [vmem:[#allocation2 + $0x108] sm:$0xff]  ;;  %v56_v23 = vld [vmem:[#allocation2 + $0x100] sm:$0xff]  ;;  %v238_v44 = vld [vmem:[#allocation2 + $0x298] sm:$0xff]  ;;  %357 = vmatpush1.msra.mxu1 %v241_v42 }
  0x28   :  { %135 = vmatpush1.msra.mxu0 %v68_v11  ;;  %v47_v24 = vld [vmem:[%s1475_s0 + $0x8] sm:$0xff]  ;;  %v54_v28 = vld [vmem:[#allocation2 + $0xc0] sm:$0xff]  ;;  %v237_v46 = vld [vmem:[#allocation2 + $0x290] sm:$0xff]  ;;  %358 = vmatprep.subr.mxu1 %v238_v44 }
  0x29   :  { %136 = vmatprep.subr.mxu0 %v67_v12  ;;  %v55_v25 = vld [vmem:[#allocation2 + $0xc8] sm:$0xff]  ;;  %188 = vmatprep.mubr.f32.mxu0 %v47_v24  ;;  %v52_v33 = vld [vmem:[#allocation2 + $0x80] sm:$0xff]  ;;  %v234_v48 = vld [vmem:[#allocation2 + $0x258] sm:$0xff] }
  0x2a   :  { %137 = vmatpush1.msra.mxu0 %v66_v13  ;;  %v53_v30 = vld [vmem:[#allocation2 + $0x88] sm:$0xff]  ;;  %v50_v37 = vld [vmem:[#allocation2 + $0x40] sm:$0xff]  ;;  %v233_v50 = vld [vmem:[#allocation2 + $0x250] sm:$0xff]  ;;  %359 = vmatpush1.msra.mxu1 %v237_v46 }
  0x2b   :  { %138 = vmatprep.subr.mxu0 %v65_v14  ;;  %v51_v35 = vld [vmem:[#allocation2 + $0x48] sm:$0xff]  ;;  %v48_v41 = vld [vmem:[#allocation2] sm:$0xff]  ;;  %v230_v52 = vld [vmem:[#allocation2 + $0x218] sm:$0xff]  ;;  %360 = vmatprep.subr.mxu1 %v234_v48 }
  0x2c   :  { %139 = vmatpush1.msra.mxu0 %v64_v15  ;;  %v49_v39 = vld [vmem:[#allocation2 + $0x8] sm:$0xff]  ;;  %v110_v45 = vld [vmem:[#allocation2 + $0x7c0] sm:$0xff]  ;;  %v229_v54 = vld [vmem:[#allocation2 + $0x210] sm:$0xff]  ;;  %361 = vmatpush1.msra.mxu1 %v233_v50 }
  0x2d   :  { %140 = vmatprep.subr.mxu0 %v63_v16  ;;  %v111_v43 = vld [vmem:[#allocation2 + $0x7c8] sm:$0xff]  ;;  %v108_v49 = vld [vmem:[#allocation2 + $0x780] sm:$0xff]  ;;  %v226_v56 = vld [vmem:[#allocation2 + $0x1d8] sm:$0xff]  ;;  %362 = vmatprep.subr.mxu1 %v230_v52 }
  0x2e   :  { %141 = vmatpush1.msra.mxu0 %v62_v17  ;;  %v109_v47 = vld [vmem:[#allocation2 + $0x788] sm:$0xff]  ;;  %v106_v53 = vld [vmem:[#allocation2 + $0x740] sm:$0xff]  ;;  %v225_v58 = vld [vmem:[#allocation2 + $0x1d0] sm:$0xff]  ;;  %363 = vmatpush1.msra.mxu1 %v229_v54 }
  0x2f   :  { %142 = vmatprep.subr.mxu0 %v61_v18  ;;  %v107_v51 = vld [vmem:[#allocation2 + $0x748] sm:$0xff]  ;;  %v104_v57 = vld [vmem:[#allocation2 + $0x700] sm:$0xff]  ;;  %v222_v60 = vld [vmem:[#allocation2 + $0x198] sm:$0xff]  ;;  %364 = vmatprep.subr.mxu1 %v226_v56 }
  0x30   :  { %143 = vmatpush1.msra.mxu0 %v60_v19  ;;  %v105_v55 = vld [vmem:[#allocation2 + $0x708] sm:$0xff]  ;;  %v102_v61 = vld [vmem:[#allocation2 + $0x6c0] sm:$0xff]  ;;  %v221_v62 = vld [vmem:[#allocation2 + $0x190] sm:$0xff]  ;;  %365 = vmatpush1.msra.mxu1 %v225_v58 }
  0x31   :  { %144 = vmatprep.subr.mxu0 %v59_v20  ;;  %v103_v59 = vld [vmem:[#allocation2 + $0x6c8] sm:$0xff]  ;;  %v218_v0 = vld [vmem:[#allocation2 + $0x158] sm:$0xff]  ;;  %v100_v1 = vld [vmem:[#allocation2 + $0x680] sm:$0xff]  ;;  %366 = vmatprep.subr.mxu1 %v222_v60 }
  0x32   :  { %145 = vmatpush1.msra.mxu0 %v58_v21  ;;  %v101_v63 = vld [vmem:[#allocation2 + $0x688] sm:$0xff]  ;;  %v217_v2 = vld [vmem:[#allocation2 + $0x150] sm:$0xff]  ;;  %367 = vmatpush1.msra.mxu1 %v221_v62  ;;  %v214_v4 = vld [vmem:[#allocation2 + $0x118] sm:$0xff] }
  0x33   :  { %146 = vmatprep.subr.mxu0 %v57_v22  ;;  %v99_v3 = vld [vmem:[#allocation2 + $0x648] sm:$0xff]  ;;  %v98_v5 = vld [vmem:[#allocation2 + $0x640] sm:$0xff]  ;;  %368 = vmatprep.subr.mxu1 %v218_v0  ;;  %v213_v6 = vld [vmem:[#allocation2 + $0x110] sm:$0xff] }
  0x34   :  { %147 = vmatpush1.msra.mxu0 %v56_v23  ;;  %v97_v7 = vld [vmem:[#allocation2 + $0x608] sm:$0xff]  ;;  %369 = vmatpush1.msra.mxu1 %v217_v2  ;;  %v210_v8 = vld [vmem:[#allocation2 + $0xd8] sm:$0xff]  ;;  %v96_v9 = vld [vmem:[#allocation2 + $0x600] sm:$0xff] }
  0x35   :  { %148 = vmatprep.subr.mxu0 %v55_v25  ;;  %370 = vmatprep.subr.mxu1 %v214_v4  ;;  %v209_v10 = vld [vmem:[#allocation2 + $0xd0] sm:$0xff]  ;;  %v95_v11 = vld [vmem:[#allocation2 + $0x5c8] sm:$0xff]  ;;  %v206_v12 = vld [vmem:[#allocation2 + $0x98] sm:$0xff] }
  0x36   :  { %149 = vmatpush1.msra.mxu0 %v54_v28  ;;  %371 = vmatpush1.msra.mxu1 %v213_v6  ;;  %v94_v13 = vld [vmem:[#allocation2 + $0x5c0] sm:$0xff]  ;;  %v205_v14 = vld [vmem:[#allocation2 + $0x90] sm:$0xff]  ;;  %v93_v15 = vld [vmem:[#allocation2 + $0x588] sm:$0xff] }
  0x37   :  { %150 = vmatprep.subr.mxu0 %v53_v30  ;;  %372 = vmatprep.subr.mxu1 %v210_v8  ;;  %v202_v16 = vld [vmem:[#allocation2 + $0x58] sm:$0xff]  ;;  %v92_v17 = vld [vmem:[#allocation2 + $0x580] sm:$0xff]  ;;  %v201_v18 = vld [vmem:[#allocation2 + $0x50] sm:$0xff] }
  0x38   :  { %151 = vmatpush1.msra.mxu0 %v52_v33  ;;  %373 = vmatpush1.msra.mxu1 %v209_v10  ;;  %v91_v19 = vld [vmem:[#allocation2 + $0x548] sm:$0xff]  ;;  %v198_v20 = vld [vmem:[#allocation2 + $0x18] sm:$0xff]  ;;  %v90_v21 = vld [vmem:[#allocation2 + $0x540] sm:$0xff] }
  0x39   :  { %152 = vmatprep.subr.mxu0 %v51_v35  ;;  %374 = vmatprep.subr.mxu1 %v206_v12  ;;  %v197_v22 = vld [vmem:[#allocation2 + $0x10] sm:$0xff]  ;;  %v89_v23 = vld [vmem:[#allocation2 + $0x508] sm:$0xff]  ;;  %v322_v24 = vld [vmem:[#allocation2 + $0x7d8] sm:$0xff] }
  0x3a   :  { %153 = vmatpush1.msra.mxu0 %v50_v37  ;;  %375 = vmatpush1.msra.mxu1 %v205_v14  ;;  %v88_v25 = vld [vmem:[#allocation2 + $0x500] sm:$0xff]  ;;  %v321_v26 = vld [vmem:[#allocation2 + $0x7d0] sm:$0xff]  ;;  %v87_v27 = vld [vmem:[#allocation2 + $0x4c8] sm:$0xff] }
  0x3b   :  { %154 = vmatprep.subr.mxu0 %v49_v39  ;;  %376 = vmatprep.subr.mxu1 %v202_v16  ;;  %v318_v28 = vld [vmem:[#allocation2 + $0x798] sm:$0xff]  ;;  %v86_v29 = vld [vmem:[#allocation2 + $0x4c0] sm:$0xff]  ;;  %v317_v30 = vld [vmem:[#allocation2 + $0x790] sm:$0xff] }
  0x3c   :  { %155 = vmatpush1.msra.mxu0 %v48_v41  ;;  %377 = vmatpush1.msra.mxu1 %v201_v18  ;;  %v85_v31 = vld [vmem:[#allocation2 + $0x488] sm:$0xff]  ;;  %v314_v32 = vld [vmem:[#allocation2 + $0x758] sm:$0xff]  ;;  %v84_v33 = vld [vmem:[#allocation2 + $0x480] sm:$0xff] }
  0x3d   :  { %156 = vmatprep.subr.mxu0 %v111_v43  ;;  %378 = vmatprep.subr.mxu1 %v198_v20  ;;  %v313_v34 = vld [vmem:[#allocation2 + $0x750] sm:$0xff]  ;;  %v83_v35 = vld [vmem:[#allocation2 + $0x448] sm:$0xff]  ;;  %v310_v36 = vld [vmem:[#allocation2 + $0x718] sm:$0xff] }
  0x3e   :  { %157 = vmatpush2.msra.mxu0 %v110_v45  ;;  %379 = vmatpush1.msra.mxu1 %v197_v22  ;;  %v82_v37 = vld [vmem:[#allocation2 + $0x440] sm:$0xff]  ;;  %v309_v38 = vld [vmem:[#allocation2 + $0x710] sm:$0xff]  ;;  %v81_v39 = vld [vmem:[#allocation2 + $0x408] sm:$0xff] }
  0x3f   :  { %158 = vmatprep.subr.mxu0 %v109_v47  ;;  %380 = vmatprep.subr.mxu1 %v322_v24  ;;  %v306_v40 = vld [vmem:[#allocation2 + $0x6d8] sm:$0xff]  ;;  %v80_v41 = vld [vmem:[#allocation2 + $0x400] sm:$0xff]  ;;  %v305_v42 = vld [vmem:[#allocation2 + $0x6d0] sm:$0xff] }
  0x40   :  { %159 = vmatpush2.msra.mxu0 %v108_v49  ;;  %381 = vmatpush2.msra.mxu1 %v321_v26  ;;  %v46_v43 = vld [vmem:[%s1475_s0] sm:$0xff]  ;;  %v260_v44 = vld [vmem:[#allocation2 + $0x3e8] sm:$0xff]  ;;  %v302_v46 = vld [vmem:[#allocation2 + $0x698] sm:$0xff] }
  0x41   :  { %160 = vmatprep.subr.mxu0 %v107_v51  ;;  %382 = vmatprep.subr.mxu1 %v318_v28  ;;  %v259_v45 = vld [vmem:[#allocation2 + $0x3e0] sm:$0xff]  ;;  %v256_v47 = vld [vmem:[#allocation2 + $0x3a8] sm:$0xff]  ;;  %v301_v48 = vld [vmem:[#allocation2 + $0x690] sm:$0xff] }
  0x42   :  { %161 = vmatpush2.msra.mxu0 %v106_v53  ;;  %383 = vmatpush2.msra.mxu1 %v317_v30  ;;  %v255_v49 = vld [vmem:[#allocation2 + $0x3a0] sm:$0xff]  ;;  %v298_v50 = vld [vmem:[#allocation2 + $0x658] sm:$0xff]  ;;  %v252_v51 = vld [vmem:[#allocation2 + $0x368] sm:$0xff] }
  0x43   :  { %162 = vmatprep.subr.mxu0 %v105_v55  ;;  %384 = vmatprep.subr.mxu1 %v314_v32  ;;  %v297_v52 = vld [vmem:[#allocation2 + $0x650] sm:$0xff]  ;;  %v251_v53 = vld [vmem:[#allocation2 + $0x360] sm:$0xff]  ;;  %v294_v54 = vld [vmem:[#allocation2 + $0x618] sm:$0xff] }
  0x44   :  { %163 = vmatpush2.msra.mxu0 %v104_v57  ;;  %385 = vmatpush2.msra.mxu1 %v313_v34  ;;  %v248_v55 = vld [vmem:[#allocation2 + $0x328] sm:$0xff]  ;;  %v293_v56 = vld [vmem:[#allocation2 + $0x610] sm:$0xff]  ;;  %v247_v57 = vld [vmem:[#allocation2 + $0x320] sm:$0xff] }
  0x45   :  { %164 = vmatprep.subr.mxu0 %v103_v59  ;;  %386 = vmatprep.subr.mxu1 %v310_v36  ;;  %v290_v58 = vld [vmem:[#allocation2 + $0x5d8] sm:$0xff]  ;;  %v244_v59 = vld [vmem:[#allocation2 + $0x2e8] sm:$0xff]  ;;  %v289_v60 = vld [vmem:[#allocation2 + $0x5d0] sm:$0xff] }
  0x46   :  { %165 = vmatpush2.msra.mxu0 %v102_v61  ;;  %387 = vmatpush2.msra.mxu1 %v309_v38  ;;  %v243_v61 = vld [vmem:[#allocation2 + $0x2e0] sm:$0xff]  ;;  %v286_v62 = vld [vmem:[#allocation2 + $0x598] sm:$0xff]  ;;  %v285_v0 = vld [vmem:[#allocation2 + $0x590] sm:$0xff] }
  0x47   :  { %166 = vmatprep.subr.mxu0 %v101_v63  ;;  %388 = vmatprep.subr.mxu1 %v306_v40  ;;  %v240_v63 = vld [vmem:[#allocation2 + $0x2a8] sm:$0xff]  ;;  %v282_v2 = vld [vmem:[#allocation2 + $0x558] sm:$0xff]  ;;  %v281_v4 = vld [vmem:[#allocation2 + $0x550] sm:$0xff] }
  0x48   :  { %167 = vmatpush2.msra.mxu0 %v100_v1  ;;  %389 = vmatpush2.msra.mxu1 %v305_v42  ;;  %v239_v1 = vld [vmem:[#allocation2 + $0x2a0] sm:$0xff]  ;;  %v278_v6 = vld [vmem:[#allocation2 + $0x518] sm:$0xff]  ;;  %v277_v8 = vld [vmem:[#allocation2 + $0x510] sm:$0xff] }
  0x49   :  { %168 = vmatprep.subr.mxu0 %v99_v3  ;;  %390 = vmatprep.subr.mxu1 %v302_v46  ;;  %v236_v3 = vld [vmem:[#allocation2 + $0x268] sm:$0xff]  ;;  %v274_v10 = vld [vmem:[#allocation2 + $0x4d8] sm:$0xff]  ;;  %v273_v12 = vld [vmem:[#allocation2 + $0x4d0] sm:$0xff] }
  0x4a   :  { %169 = vmatpush2.msra.mxu0 %v98_v5  ;;  %391 = vmatpush2.msra.mxu1 %v301_v48  ;;  %v235_v5 = vld [vmem:[#allocation2 + $0x260] sm:$0xff]  ;;  %v270_v14 = vld [vmem:[#allocation2 + $0x498] sm:$0xff] }
  0x4b   :  { %170 = vmatprep.subr.mxu0 %v97_v7  ;;  %392 = vmatprep.subr.mxu1 %v298_v50  ;;  %v232_v7 = vld [vmem:[#allocation2 + $0x228] sm:$0xff]  ;;  %v223_v16 = vld [vmem:[#allocation2 + $0x1a0] sm:$0xff] }
  0x4c   :  { %171 = vmatpush2.msra.mxu0 %v96_v9  ;;  %393 = vmatpush2.msra.mxu1 %v297_v52  ;;  %v231_v9 = vld [vmem:[#allocation2 + $0x220] sm:$0xff] }
  0x4d   :  { %172 = vmatprep.subr.mxu0 %v95_v11  ;;  %394 = vmatprep.subr.mxu1 %v294_v54  ;;  %v228_v11 = vld [vmem:[#allocation2 + $0x1e8] sm:$0xff]  ;;  %v219_v18 = vld [vmem:[#allocation2 + $0x160] sm:$0xff] }
  0x4e   :  { %173 = vmatpush2.msra.mxu0 %v94_v13  ;;  %395 = vmatpush2.msra.mxu1 %v293_v56  ;;  %v227_v13 = vld [vmem:[#allocation2 + $0x1e0] sm:$0xff]  ;;  %v269_v56 = vld [vmem:[#allocation2 + $0x490] sm:$0xff] }
  0x4f   :  { %174 = vmatprep.subr.mxu0 %v93_v15  ;;  %396 = vmatprep.subr.mxu1 %v290_v58  ;;  %v224_v15 = vld [vmem:[#allocation2 + $0x1a8] sm:$0xff]  ;;  %v215_v20 = vld [vmem:[#allocation2 + $0x120] sm:$0xff]  ;;  %v266_v58 = vld [vmem:[#allocation2 + $0x458] sm:$0xff] }
  0x50   :  { %175 = vmatpush2.msra.mxu0 %v92_v17  ;;  %397 = vmatpush2.msra.mxu1 %v289_v60  ;;  %v220_v17 = vld [vmem:[#allocation2 + $0x168] sm:$0xff]  ;;  %v211_v22 = vld [vmem:[#allocation2 + $0xe0] sm:$0xff]  ;;  %v265_v60 = vld [vmem:[#allocation2 + $0x450] sm:$0xff] }
  0x51   :  { %176 = vmatprep.subr.mxu0 %v91_v19  ;;  %398 = vmatprep.subr.mxu1 %v286_v62  ;;  %v216_v19 = vld [vmem:[#allocation2 + $0x128] sm:$0xff]  ;;  %v207_v24 = vld [vmem:[#allocation2 + $0xa0] sm:$0xff]  ;;  %v262_v62 = vld [vmem:[#allocation2 + $0x418] sm:$0xff] }
  0x52   :  { %177 = vmatpush2.msra.mxu0 %v90_v21  ;;  %399 = vmatpush2.msra.mxu1 %v285_v0  ;;  %v212_v21 = vld [vmem:[#allocation2 + $0xe8] sm:$0xff]  ;;  %v203_v26 = vld [vmem:[#allocation2 + $0x60] sm:$0xff]  ;;  %v261_v0 = vld [vmem:[#allocation2 + $0x410] sm:$0xff] }
  0x53   :  { %178 = vmatprep.subr.mxu0 %v89_v23  ;;  %400 = vmatprep.subr.mxu1 %v282_v2  ;;  %v208_v23 = vld [vmem:[#allocation2 + $0xa8] sm:$0xff]  ;;  %v199_v28 = vld [vmem:[#allocation2 + $0x20] sm:$0xff] }
  0x54   :  { %179 = vmatpush2.msra.mxu0 %v88_v25  ;;  %401 = vmatpush2.msra.mxu1 %v281_v4  ;;  %v204_v25 = vld [vmem:[#allocation2 + $0x68] sm:$0xff]  ;;  %v323_v30 = vld [vmem:[#allocation2 + $0x7e0] sm:$0xff]  ;;  %v114_v4 = vlaneseq }
  0x55   :  { %180 = vmatprep.subr.mxu0 %v87_v27  ;;  %402 = vmatprep.subr.mxu1 %v278_v6  ;;  %v200_v27 = vld [vmem:[#allocation2 + $0x28] sm:$0xff]  ;;  %v319_v32 = vld [vmem:[#allocation2 + $0x7a0] sm:$0xff] }
  0x56   :  { %181 = vmatpush2.msra.mxu0 %v86_v29  ;;  %403 = vmatpush2.msra.mxu1 %v277_v8  ;;  %v324_v29 = vld [vmem:[#allocation2 + $0x7e8] sm:$0xff]  ;;  %v315_v34 = vld [vmem:[#allocation2 + $0x760] sm:$0xff] }
  0x57   :  { %182 = vmatprep.subr.mxu0 %v85_v31  ;;  %404 = vmatprep.subr.mxu1 %v274_v10  ;;  %v320_v31 = vld [vmem:[#allocation2 + $0x7a8] sm:$0xff]  ;;  %v311_v36 = vld [vmem:[#allocation2 + $0x720] sm:$0xff] }
  0x58   :  { %183 = vmatpush2.msra.mxu0 %v84_v33  ;;  %405 = vmatpush2.msra.mxu1 %v273_v12  ;;  %v316_v33 = vld [vmem:[#allocation2 + $0x768] sm:$0xff]  ;;  %v307_v38 = vld [vmem:[#allocation2 + $0x6e0] sm:$0xff] }
  0x59   :  { %184 = vmatprep.subr.mxu0 %v83_v35  ;;  %406 = vmatprep.subr.mxu1 %v270_v14  ;;  %v312_v35 = vld [vmem:[#allocation2 + $0x728] sm:$0xff]  ;;  %v303_v40 = vld [vmem:[#allocation2 + $0x6a0] sm:$0xff] }
  0x5a   :  { %185 = vmatpush2.msra.mxu0 %v82_v37  ;;  %v308_v37 = vld [vmem:[#allocation2 + $0x6e8] sm:$0xff]  ;;  %v299_v42 = vld [vmem:[#allocation2 + $0x660] sm:$0xff]  ;;  %407 = vmatpush2.msra.mxu1 %v269_v56  ;;  %v561_v56 = vld [vmem:[#allocation2 + $0x6f8] sm:$0xff] }
  0x5b   :  { %186 = vmatprep.subr.mxu0 %v81_v39  ;;  %v304_v39 = vld [vmem:[#allocation2 + $0x6a8] sm:$0xff]  ;;  %v291_v46 = vld [vmem:[#allocation2 + $0x5e0] sm:$0xff]  ;;  %408 = vmatprep.subr.mxu1 %v266_v58  ;;  %v559_v58 = vld [vmem:[#allocation2 + $0x6b8] sm:$0xff] }
  0x5c   :  { %187 = vmatpush2.msra.mxu0 %v80_v41  ;;  %v300_v41 = vld [vmem:[#allocation2 + $0x668] sm:$0xff]  ;;  %v287_v48 = vld [vmem:[#allocation2 + $0x5a0] sm:$0xff]  ;;  %409 = vmatpush2.msra.mxu1 %v265_v60  ;;  %v557_v60 = vld [vmem:[#allocation2 + $0x678] sm:$0xff] }
  0x5d   :  { %189 = vmatmul.mubr.f32.vlgmr.msra.gmra.mxu0 %v46_v43  ;;  %419 = vmatprep.subr.mxu0 %v260_v44  ;;  %v296_v43 = vld [vmem:[#allocation2 + $0x628] sm:$0xff]  ;;  %v295_v44 = vld [vmem:[#allocation2 + $0x620] sm:$0xff] }
  0x5e   :  { %420 = vmatpush1.msra.mxu0 %v259_v45  ;;  %v292_v45 = vld [vmem:[#allocation2 + $0x5e8] sm:$0xff]  ;;  %v283_v50 = vld [vmem:[#allocation2 + $0x560] sm:$0xff]  ;;  %410 = vmatprep.subr.mxu1 %v262_v62  ;;  %v555_v62 = vld [vmem:[#allocation2 + $0x638] sm:$0xff] }
  0x5f   :  { %421 = vmatprep.subr.mxu0 %v256_v47  ;;  %v288_v47 = vld [vmem:[#allocation2 + $0x5a8] sm:$0xff]  ;;  %v279_v52 = vld [vmem:[#allocation2 + $0x520] sm:$0xff]  ;;  %411 = vmatpush2.msra.mxu1 %v261_v0  ;;  %v553_v0 = vld [vmem:[#allocation2 + $0x5f8] sm:$0xff] }
  0x60   :  { %422 = vmatpush1.msra.mxu0 %v255_v49  ;;  %v284_v49 = vld [vmem:[#allocation2 + $0x568] sm:$0xff]  ;;  %v275_v54 = vld [vmem:[#allocation2 + $0x4e0] sm:$0xff] }
  0x61   :  { %423 = vmatprep.subr.mxu0 %v252_v51  ;;  %v280_v51 = vld [vmem:[#allocation2 + $0x528] sm:$0xff]  ;;  %v263_v2 = vld [vmem:[#allocation2 + $0x420] sm:$0xff] }
  0x62   :  { %424 = vmatpush1.msra.mxu0 %v251_v53  ;;  %v276_v53 = vld [vmem:[#allocation2 + $0x4e8] sm:$0xff] }
  0x63   :  { %425 = vmatprep.subr.mxu0 %v248_v55  ;;  %v272_v55 = vld [vmem:[#allocation2 + $0x4a8] sm:$0xff] }
  0x64   :  { %426 = vmatpush1.msra.mxu0 %v247_v57  ;;  %v271_v57 = vld [vmem:[#allocation2 + $0x4a0] sm:$0xff] }
  0x65   :  { %427 = vmatprep.subr.mxu0 %v244_v59  ;;  %v268_v59 = vld [vmem:[#allocation2 + $0x468] sm:$0xff] }
  0x66   :  { %428 = vmatpush1.msra.mxu0 %v243_v61  ;;  %v267_v61 = vld [vmem:[#allocation2 + $0x460] sm:$0xff] }
  0x67   :  { %429 = vmatprep.subr.mxu0 %v240_v63  ;;  %v264_v63 = vld [vmem:[#allocation2 + $0x428] sm:$0xff] }
  0x68   :  { %430 = vmatpush1.msra.mxu0 %v239_v1  ;;  %v1355_v1 = vld [vmem:[%s1475_s0 + $0x10] sm:$0xff] }
  0x69   :  { %431 = vmatprep.subr.mxu0 %v236_v3  ;;  %412 = vmatprep.mubr.f32.mxu1 %v1355_v1  ;;  %v537_v3 = vld [vmem:[#allocation2 + $0x3f8] sm:$0xff] }
  0x6a   :  { %432 = vmatpush1.msra.mxu0 %v235_v5  ;;  %483 = vmatprep.mubr.f32.mxu0 %v1355_v1  ;;  %v1359_v5 = vshrl.u32 %v114_v4, 7  ;;  %v550_v4 = vld [vmem:[#allocation2 + $0x5b0] sm:$0xff] }
  0x6b   :  { %433 = vmatprep.subr.mxu0 %v232_v7  ;;  %583 = vmatprep.subr.mxu1 %v537_v3  ;;  %v112_v7 = vld [vmem:[%s1478_s3] ss:$8 sm:$0x3]  ;;  %v551_v3 = vld [vmem:[#allocation2 + $0x5b8] sm:$0xff] }
  0x6c   :  { %434 = vmatpush1.msra.mxu0 %v231_v9  ;;  %v1362_v6 = vsub.s32 0, %v1359_v5  ;;  %v1368_v8 = vsub.s32 1, %v1359_v5 }
  0x6d   :  { %435 = vmatprep.subr.mxu0 %v228_v11 }
  0x6e   :  { %436 = vmatpush1.msra.mxu0 %v227_v13  ;;  %v117_v9 = vrot.slane %v112_v7, %v1362_v6  ;;  %v121_v10 = vrot.slane %v112_v7, %v1368_v8  ;;  %v549_v7 = vld [vmem:[#allocation2 + $0x578] sm:$0xff] }
  0x6f   :  { %437 = vmatprep.subr.mxu0 %v224_v15 }
  0x70   :  { %438 = vmatpush1.msra.mxu0 %v223_v16  ;;  %v536_v16 = vld [vmem:[#allocation2 + $0x3f0] sm:$0xff] }
  0x71   :  { %439 = vmatprep.subr.mxu0 %v220_v17  ;;  %v535_v17 = vld [vmem:[#allocation2 + $0x3b8] sm:$0xff] }
  0x72   :  { %440 = vmatpush1.msra.mxu0 %v219_v18 }
  0x73   :  { %441 = vmatprep.subr.mxu0 %v216_v19  ;;  %v534_v19 = vld [vmem:[#allocation2 + $0x3b0] sm:$0xff] }
  0x74   :  { %442 = vmatpush1.msra.mxu0 %v215_v20  ;;  %v533_v20 = vld [vmem:[#allocation2 + $0x378] sm:$0xff] }
  0x75   :  { %443 = vmatprep.subr.mxu0 %v212_v21  ;;  %v532_v21 = vld [vmem:[#allocation2 + $0x370] sm:$0xff] }
  0x76   :  { %444 = vmatpush1.msra.mxu0 %v211_v22  ;;  %v531_v22 = vld [vmem:[#allocation2 + $0x338] sm:$0xff] }
  0x77   :  { %445 = vmatprep.subr.mxu0 %v208_v23  ;;  %v530_v23 = vld [vmem:[#allocation2 + $0x330] sm:$0xff] }
  0x78   :  { %446 = vmatpush1.msra.mxu0 %v207_v24  ;;  %v529_v24 = vld [vmem:[#allocation2 + $0x2f8] sm:$0xff] }
  0x79   :  { %447 = vmatprep.subr.mxu0 %v204_v25  ;;  %v528_v25 = vld [vmem:[#allocation2 + $0x2f0] sm:$0xff] }
  0x7a   :  { %448 = vmatpush1.msra.mxu0 %v203_v26  ;;  %v527_v26 = vld [vmem:[#allocation2 + $0x2b8] sm:$0xff] }
  0x7b   :  { %449 = vmatprep.subr.mxu0 %v200_v27  ;;  %v526_v27 = vld [vmem:[#allocation2 + $0x2b0] sm:$0xff] }
  0x7c   :  { %450 = vmatpush1.msra.mxu0 %v199_v28  ;;  %v525_v28 = vld [vmem:[#allocation2 + $0x278] sm:$0xff] }
  0x7d   :  { %451 = vmatprep.subr.mxu0 %v324_v29  ;;  %v524_v29 = vld [vmem:[#allocation2 + $0x270] sm:$0xff] }
  0x7e   :  { %452 = vmatpush2.msra.mxu0 %v323_v30  ;;  %v523_v30 = vld [vmem:[#allocation2 + $0x238] sm:$0xff] }
  0x7f   :  { %453 = vmatprep.subr.mxu0 %v320_v31  ;;  %v522_v31 = vld [vmem:[#allocation2 + $0x230] sm:$0xff] }
  0x80   :  { %454 = vmatpush2.msra.mxu0 %v319_v32  ;;  %v521_v32 = vld [vmem:[#allocation2 + $0x1f8] sm:$0xff] }
  0x81   :  { %455 = vmatprep.subr.mxu0 %v316_v33  ;;  %v520_v33 = vld [vmem:[#allocation2 + $0x1f0] sm:$0xff] }
  0x82   :  { %456 = vmatpush2.msra.mxu0 %v315_v34  ;;  %v519_v34 = vld [vmem:[#allocation2 + $0x1b8] sm:$0xff] }
  0x83   :  { %457 = vmatprep.subr.mxu0 %v312_v35  ;;  %v518_v35 = vld [vmem:[#allocation2 + $0x1b0] sm:$0xff] }
  0x84   :  { %458 = vmatpush2.msra.mxu0 %v311_v36  ;;  %v517_v36 = vld [vmem:[#allocation2 + $0x178] sm:$0xff] }
  0x85   :  { %459 = vmatprep.subr.mxu0 %v308_v37  ;;  %v516_v37 = vld [vmem:[#allocation2 + $0x170] sm:$0xff] }
  0x86   :  { %460 = vmatpush2.msra.mxu0 %v307_v38  ;;  %v515_v38 = vld [vmem:[#allocation2 + $0x138] sm:$0xff] }
  0x87   :  { %461 = vmatprep.subr.mxu0 %v304_v39  ;;  %v514_v39 = vld [vmem:[#allocation2 + $0x130] sm:$0xff] }
  0x88   :  { %462 = vmatpush2.msra.mxu0 %v303_v40  ;;  %v513_v40 = vld [vmem:[#allocation2 + $0xf8] sm:$0xff] }
  0x89   :  { %463 = vmatprep.subr.mxu0 %v300_v41  ;;  %v512_v41 = vld [vmem:[#allocation2 + $0xf0] sm:$0xff] }
  0x8a   :  { %464 = vmatpush2.msra.mxu0 %v299_v42  ;;  %v511_v42 = vld [vmem:[#allocation2 + $0xb8] sm:$0xff] }
  0x8b   :  { %465 = vmatprep.subr.mxu0 %v296_v43  ;;  %v510_v43 = vld [vmem:[#allocation2 + $0xb0] sm:$0xff] }
  0x8c   :  { %466 = vmatpush2.msra.mxu0 %v295_v44  ;;  %v509_v44 = vld [vmem:[#allocation2 + $0x78] sm:$0xff] }
  0x8d   :  { %467 = vmatprep.subr.mxu0 %v292_v45  ;;  %v508_v45 = vld [vmem:[#allocation2 + $0x70] sm:$0xff] }
  0x8e   :  { %468 = vmatpush2.msra.mxu0 %v291_v46  ;;  %v507_v46 = vld [vmem:[#allocation2 + $0x38] sm:$0xff] }
  0x8f   :  { %469 = vmatprep.subr.mxu0 %v288_v47  ;;  %v506_v47 = vld [vmem:[#allocation2 + $0x30] sm:$0xff] }
  0x90   :  { %470 = vmatpush2.msra.mxu0 %v287_v48  ;;  %v569_v48 = vld [vmem:[#allocation2 + $0x7f8] sm:$0xff] }
  0x91   :  { %471 = vmatprep.subr.mxu0 %v284_v49  ;;  %v568_v49 = vld [vmem:[#allocation2 + $0x7f0] sm:$0xff] }
  0x92   :  { %472 = vmatpush2.msra.mxu0 %v283_v50  ;;  %v567_v50 = vld [vmem:[#allocation2 + $0x7b8] sm:$0xff] }
  0x93   :  { %473 = vmatprep.subr.mxu0 %v280_v51  ;;  %v566_v51 = vld [vmem:[#allocation2 + $0x7b0] sm:$0xff] }
  0x94   :  { %474 = vmatpush2.msra.mxu0 %v279_v52  ;;  %v565_v52 = vld [vmem:[#allocation2 + $0x778] sm:$0xff] }
  0x95   :  { %475 = vmatprep.subr.mxu0 %v276_v53  ;;  %v564_v53 = vld [vmem:[#allocation2 + $0x770] sm:$0xff] }
  0x96   :  { %476 = vmatpush2.msra.mxu0 %v275_v54  ;;  %v563_v54 = vld [vmem:[#allocation2 + $0x738] sm:$0xff] }
  0x97   :  { %477 = vmatprep.subr.mxu0 %v272_v55  ;;  %v562_v55 = vld [vmem:[#allocation2 + $0x730] sm:$0xff] }
  0x98   :  { %478 = vmatpush2.msra.mxu0 %v271_v57  ;;  %v560_v57 = vld [vmem:[#allocation2 + $0x6f0] sm:$0xff] }
  0x99   :  { %479 = vmatprep.subr.mxu0 %v268_v59  ;;  %v558_v59 = vld [vmem:[#allocation2 + $0x6b0] sm:$0xff] }
  0x9a   :  { %480 = vmatpush2.msra.mxu0 %v267_v61  ;;  %v556_v61 = vld [vmem:[#allocation2 + $0x670] sm:$0xff] }
  0x9b   :  { %481 = vmatprep.subr.mxu0 %v264_v63  ;;  %v554_v63 = vld [vmem:[#allocation2 + $0x630] sm:$0xff] }
  0x9c   :  { %482 = vmatpush2.msra.mxu0 %v263_v2  ;;  %v552_v2 = vld [vmem:[#allocation2 + $0x5f0] sm:$0xff] }
 0x11d   :  { %v190_v11 = vpop.f32.mrf.mxu0 }
 0x11e   :  { %v191_v12 = vadd.f32 %v190_v11, %v117_v9  ;;  %v548_v9 = vld [vmem:[#allocation2 + $0x570] sm:$0xff] }
 0x11f   :  { %v192_v13 = vpop.f32.mrf.mxu0  ;;  %v546_v11 = vld [vmem:[#allocation2 + $0x530] sm:$0xff] }
 0x120   :  { %v195_v14 = vmax.f32 %v191_v12, 0.0  ;;  %v193_v15 = vadd.f32 %v192_v13, %v121_v10  ;;  %v547_v10 = vld [vmem:[#allocation2 + $0x538] sm:$0xff]  ;;  %v544_v13 = vld [vmem:[#allocation2 + $0x4f0] sm:$0xff] }
 0x121   :  { %v545_v12 = vld [vmem:[#allocation2 + $0x4f8] sm:$0xff] }
 0x122   :  { %v196_v18 = vmax.f32 %v193_v15, 0.0  ;;  %413 = vmatmul.mubr.f32.vlgmr.msra.gmra.mxu1 %v195_v14  ;;  %484 = vmatmul.mubr.f32.vlgmr.msra.gmra.mxu0 %v195_v14  ;;  %v543_v14 = vld [vmem:[#allocation2 + $0x4b8] sm:$0xff]  ;;  %v542_v15 = vld [vmem:[#allocation2 + $0x4b0] sm:$0xff] }
 0x123   :  { %584 = vmatpush1.msra.mxu1 %v536_v16  ;;  %v541_v16 = vld [vmem:[#allocation2 + $0x478] sm:$0xff] }
 0x124   :  { %647 = vmatprep.mubr.f32.mxu1 %v196_v18  ;;  %585 = vmatprep.subr.mxu1 %v535_v17  ;;  %v540_v17 = vld [vmem:[#allocation2 + $0x470] sm:$0xff]  ;;  %v539_v18 = vld [vmem:[#allocation2 + $0x438] sm:$0xff] }
 0x125   :  { %586 = vmatpush1.msra.mxu1 %v534_v19  ;;  %v538_v19 = vld [vmem:[#allocation2 + $0x430] sm:$0xff] }
 0x126   :  { %587 = vmatprep.subr.mxu1 %v533_v20  ;;  %v1027_v20 = vld [vmem:[%s1478_s3 + $0x1] ss:$8 sm:$0xf] }
 0x127   :  { %588 = vmatpush1.msra.mxu1 %v532_v21  ;;  %v331_v21 = vrot.slane %v1027_v20, %v1362_v6 }
 0x128   :  { %589 = vmatprep.subr.mxu1 %v531_v22 }
 0x129   :  { %590 = vmatpush1.msra.mxu1 %v530_v23 }
 0x12a   :  { %591 = vmatprep.subr.mxu1 %v529_v24 }
 0x12b   :  { %592 = vmatpush1.msra.mxu1 %v528_v25 }
 0x12c   :  { %593 = vmatprep.subr.mxu1 %v527_v26  ;;  %v335_v26 = vrot.slane %v1027_v20, %v1368_v8 }
 0x12d   :  { %594 = vmatpush1.msra.mxu1 %v526_v27 }
 0x12e   :  { %595 = vmatprep.subr.mxu1 %v525_v28 }
 0x12f   :  { %596 = vmatpush1.msra.mxu1 %v524_v29 }
 0x130   :  { %597 = vmatprep.subr.mxu1 %v523_v30 }
 0x131   :  { %598 = vmatpush1.msra.mxu1 %v522_v31 }
 0x132   :  { %599 = vmatprep.subr.mxu1 %v521_v32 }
 0x133   :  { %600 = vmatpush1.msra.mxu1 %v520_v33  ;;  %v342_v33 = vsub.s32 3, %v1359_v5 }
 0x134   :  { %601 = vmatprep.subr.mxu1 %v519_v34 }
 0x135   :  { %602 = vmatpush1.msra.mxu1 %v518_v35  ;;  %v338_v35 = vsub.s32 2, %v1359_v5  ;;  %v1313_v5 = vmov 0.0  }
 0x136   :  { %603 = vmatprep.subr.mxu1 %v517_v36  ;;  %v343_v36 = vrot.slane %v1027_v20, %v342_v33  ;;  %1097 = vmatprep.subr.mxu0 %v1313_v5 }
 0x137   :  { %604 = vmatpush1.msra.mxu1 %v516_v37  ;;  %1129 = vmatprep.mubr.msk.f32.mxu0 %vm1314_vm0, %v1313_v5 }
 0x138   :  { %605 = vmatprep.subr.mxu1 %v515_v38  ;;  %v339_v38 = vrot.slane %v1027_v20, %v338_v35 }
 0x139   :  { %606 = vmatpush1.msra.mxu1 %v514_v39 }
 0x13a   :  { %607 = vmatprep.subr.mxu1 %v513_v40 }
 0x13b   :  { %608 = vmatpush1.msra.mxu1 %v512_v41 }
 0x13c   :  { %609 = vmatprep.subr.mxu1 %v511_v42 }
 0x13d   :  { %610 = vmatpush1.msra.mxu1 %v510_v43 }
 0x13e   :  { %611 = vmatprep.subr.mxu1 %v509_v44 }
 0x13f   :  { %612 = vmatpush1.msra.mxu1 %v508_v45 }
 0x140   :  { %613 = vmatprep.subr.mxu1 %v507_v46 }
 0x141   :  { %614 = vmatpush1.msra.mxu1 %v506_v47 }
 0x142   :  { %615 = vmatprep.subr.mxu1 %v569_v48 }
 0x143   :  { %616 = vmatpush2.msra.mxu1 %v568_v49 }
 0x144   :  { %617 = vmatprep.subr.mxu1 %v567_v50 }
 0x145   :  { %618 = vmatpush2.msra.mxu1 %v566_v51  ;;  %v680_v51 = vld [vmem:[#allocation4 + $0x78] sm:$0xff] }
 0x146   :  { %619 = vmatprep.subr.mxu1 %v565_v52  ;;  %1098 = vmatpush3.msra.mxu0 %v680_v51  ;;  %v679_v52 = vld [vmem:[#allocation4 + $0x70] sm:$0xff]  ;;  %v681_v51 = vld [vmem:[%s1478_s3 + $0x3] ss:$0 sm:$0xff] }
 0x147   :  { %620 = vmatpush2.msra.mxu1 %v564_v53  ;;  %1099 = vmatprep.subr.mxu0 %v1313_v5  ;;  %v677_v53 = vld [vmem:[#allocation4 + $0x60] sm:$0xff] }
 0x148   :  { %621 = vmatprep.subr.mxu1 %v563_v54  ;;  %1100 = vmatpush3.msra.mxu0 %v679_v52  ;;  %v676_v54 = vld [vmem:[#allocation4 + $0x58] sm:$0xff] }
 0x149   :  { %622 = vmatpush2.msra.mxu1 %v562_v55  ;;  %1101 = vmatprep.subr.mxu0 %v1313_v5  ;;  %v675_v55 = vld [vmem:[#allocation4 + $0x50] sm:$0xff] }
 0x14a   :  { %623 = vmatprep.subr.mxu1 %v561_v56  ;;  %v674_v56 = vld [vmem:[#allocation4 + $0x48] sm:$0xff] }
 0x14b   :  { %624 = vmatpush2.msra.mxu1 %v560_v57  ;;  %v673_v57 = vld [vmem:[#allocation4 + $0x40] sm:$0xff] }
 0x14c   :  { %625 = vmatprep.subr.mxu1 %v559_v58  ;;  %v672_v58 = vld [vmem:[#allocation4 + $0x38] sm:$0xff] }
 0x14d   :  { %626 = vmatpush2.msra.mxu1 %v558_v59  ;;  %v671_v59 = vld [vmem:[#allocation4 + $0x30] sm:$0xff] }
 0x14e   :  { %627 = vmatprep.subr.mxu1 %v557_v60  ;;  %v670_v60 = vld [vmem:[#allocation4 + $0x28] sm:$0xff] }
 0x14f   :  { %628 = vmatpush2.msra.mxu1 %v556_v61  ;;  %v669_v61 = vld [vmem:[#allocation4 + $0x20] sm:$0xff] }
 0x150   :  { %629 = vmatprep.subr.mxu1 %v555_v62  ;;  %v668_v62 = vld [vmem:[#allocation4 + $0x18] sm:$0xff] }
 0x151   :  { %630 = vmatpush2.msra.mxu1 %v554_v63  ;;  %v667_v63 = vld [vmem:[#allocation4 + $0x10] sm:$0xff] }
 0x152   :  { %631 = vmatprep.subr.mxu1 %v553_v0  ;;  %v666_v0 = vld [vmem:[#allocation4 + $0x8] sm:$0xff] }
 0x153   :  { %632 = vmatpush2.msra.mxu1 %v552_v2  ;;  %v665_v2 = vld [vmem:[#allocation4] sm:$0xff] }
 0x154   :  { %633 = vmatprep.subr.mxu1 %v551_v3  ;;  %v769_v3 = vld [vmem:[#allocation4 + $0xf8] sm:$0xff] }
 0x155   :  { %634 = vmatpush2.msra.mxu1 %v550_v4  ;;  %v768_v4 = vld [vmem:[#allocation4 + $0xf0] sm:$0xff] }
 0x156   :  { %635 = vmatprep.subr.mxu1 %v549_v7  ;;  %v767_v7 = vld [vmem:[#allocation4 + $0xe8] sm:$0xff] }
 0x157   :  { %636 = vmatpush2.msra.mxu1 %v548_v9  ;;  %v766_v9 = vld [vmem:[#allocation4 + $0xe0] sm:$0xff] }
 0x158   :  { %637 = vmatprep.subr.mxu1 %v547_v10  ;;  %v765_v10 = vld [vmem:[#allocation4 + $0xd8] sm:$0xff] }
 0x159   :  { %638 = vmatpush2.msra.mxu1 %v546_v11  ;;  %v764_v11 = vld [vmem:[#allocation4 + $0xd0] sm:$0xff] }
 0x15a   :  { %639 = vmatprep.subr.mxu1 %v545_v12  ;;  %v763_v12 = vld [vmem:[#allocation4 + $0xc8] sm:$0xff] }
 0x15b   :  { %640 = vmatpush2.msra.mxu1 %v544_v13  ;;  %v762_v13 = vld [vmem:[#allocation4 + $0xc0] sm:$0xff] }
 0x15c   :  { %641 = vmatprep.subr.mxu1 %v543_v14  ;;  %v761_v14 = vld [vmem:[#allocation4 + $0xb8] sm:$0xff] }
 0x15d   :  { %642 = vmatpush2.msra.mxu1 %v542_v15  ;;  %v760_v15 = vld [vmem:[#allocation4 + $0xb0] sm:$0xff] }
 0x15e   :  { %643 = vmatprep.subr.mxu1 %v541_v16  ;;  %v759_v16 = vld [vmem:[#allocation4 + $0xa8] sm:$0xff] }
 0x15f   :  { %644 = vmatpush2.msra.mxu1 %v540_v17  ;;  %v758_v17 = vld [vmem:[#allocation4 + $0xa0] sm:$0xff] }
 0x160   :  { %645 = vmatprep.subr.mxu1 %v539_v18  ;;  %v757_v18 = vld [vmem:[#allocation4 + $0x98] sm:$0xff] }
 0x161   :  { %646 = vmatpush2.msra.mxu1 %v538_v19  ;;  %v1028_v19 = vld [vmem:[%s1478_s3 + $0x2] ss:$8 sm:$0x3] }
 0x162   :  { %1132 = vmatprep.subr.mxu1 %v1313_v5  ;;  %v576_v20 = vrot.slane %v1028_v19, %v1362_v6 }
 0x1e2   :  { %v414_v22 = vpop.f32.mrf.mxu1  ;;  %v485_v34 = vpop.f32.mrf.mxu0 }
 0x1e3   :  { %v415_v23 = vadd.f32 %v414_v22, %v331_v21  ;;  %v486_v42 = vadd.f32 %v485_v34, %v339_v38  ;;  %v580_v21 = vrot.slane %v1028_v19, %v1368_v8  ;;  %v756_v8 = vld [vmem:[#allocation4 + $0x90] sm:$0xff]  ;;  %v858_v38 = vld [vmem:[#allocation4 + $0x178] sm:$0xff]  ;;  %v859_v19 = vld [vmem:[%s1478_s3 + $0x5] ss:$0 sm:$0xff] }
 0x1e4   :  { %v416_v27 = vpop.f32.mrf.mxu1  ;;  %v487_v37 = vpop.f32.mrf.mxu0 }
 0x1e5   :  { %v490_v24 = vsub.f32 0.0, %v415_v23  ;;  %v417_v28 = vadd.f32 %v416_v27, %v335_v26  ;;  %v488_v40 = vadd.f32 %v487_v37, %v343_v36  ;;  %v755_v36 = vld [vmem:[#allocation4 + $0x88] sm:$0xff]  ;;  %v754_v37 = vld [vmem:[#allocation4 + $0x80] sm:$0xff] }
 0x1e7   :  { %v491_v25 = vmul.f32 1.442695, %v490_v24  ;;  %v495_v29 = vsub.f32 0.0, %v417_v28 }
 0x1e9   :  { %1245 = vpow2.f32 %v491_v25  ;;  %v496_v30 = vmul.f32 1.442695, %v495_v29 }
 0x1eb   :  { %1247 = vpow2.f32 %v496_v30 }
 0x1f6   :  { %v1246_v31 = vpop.eup %1245 }
 0x1f7   :  { %v493_v32 = vadd.f32 1.0, %v1246_v31 }
 0x1f8   :  { %v1248_v39 = vpop.eup %1247 }
 0x1f9   :  { %1249 = vrcp.f32 %v493_v32  ;;  %v498_v44 = vadd.f32 1.0, %v1248_v39  ;;  %v857_v39 = vld [vmem:[#allocation4 + $0x170] sm:$0xff] }
 0x206   :  { %v1250_v41 = vpop.eup %1249 }
 0x207   :  { %v500_v43 = vmul.f32 %v1250_v41, %v488_v40  ;;  %v856_v40 = vld [vmem:[#allocation4 + $0x168] sm:$0xff]  ;;  %v855_v41 = vld [vmem:[#allocation4 + $0x160] sm:$0xff] }
 0x209   :  { %v501_v45 = vadd.f32 %v500_v43, %v486_v42  ;;  %v854_v42 = vld [vmem:[#allocation4 + $0x158] sm:$0xff]  ;;  %v853_v43 = vld [vmem:[#allocation4 + $0x150] sm:$0xff] }
 0x20b   :  { %1251 = vtanh.f32 %v501_v45  ;;  %v851_v45 = vld [vmem:[#allocation4 + $0x140] sm:$0xff] }
 0x20c   :  { %1253 = vrcp.f32 %v498_v44  ;;  %v852_v44 = vld [vmem:[#allocation4 + $0x148] sm:$0xff] }
 0x218   :  { %v1252_v46 = vpop.eup %1251 }
 0x219   :  { %v503_v47 = vsub.f32 %v1355_v1, %v1252_v46  ;;  %v1254_v48 = vpop.eup %1253  ;;  %v678_v1 = vld [vmem:[#allocation4 + $0x68] sm:$0xff] }
 0x21a   :  { %1102 = vmatpush3.msra.mxu0 %v678_v1 }
 0x21b   :  { %v504_v49 = vmul.f32 %v1254_v48, %v503_v47  ;;  %1103 = vmatprep.subr.mxu0 %v1313_v5  ;;  %v849_v47 = vld [vmem:[#allocation4 + $0x130] sm:$0xff]  ;;  %v848_v48 = vld [vmem:[#allocation4 + $0x128] sm:$0xff] }
 0x21c   :  { %1104 = vmatpush3.msra.mxu0 %v677_v53 }
 0x21d   :  { %v505_v50 = vadd.f32 %v1252_v46, %v504_v49  ;;  %1105 = vmatprep.subr.mxu0 %v1313_v5  ;;  %v850_v46 = vld [vmem:[#allocation4 + $0x138] sm:$0xff]  ;;  %v847_v49 = vld [vmem:[#allocation4 + $0x120] sm:$0xff] }
 0x21e   :  { %1106 = vmatpush3.msra.mxu0 %v676_v54 }
 0x21f   :  { %648 = vmatmul.mubr.f32.vlgmr.msra.gmra.mxu1 %v505_v50  ;;  %1020 = vst [vmem:[%s1479_s4 + $0x8] sm:$0xff] %v505_v50  ;;  %1107 = vmatprep.subr.mxu0 %v1313_v5  ;;  %v846_v50 = vld [vmem:[#allocation4 + $0x118] sm:$0xff] }
 0x220   :  { %1108 = vmatpush3.msra.mxu0 %v675_v55  ;;  %1164 = vmatprep.mubr.msk.f32.mxu1 %vm1314_vm0, %v1313_v5  ;;  %v845_v55 = vld [vmem:[#allocation4 + $0x110] sm:$0xff] }
 0x221   :  { %1109 = vmatprep.subr.mxu0 %v1313_v5  ;;  %1133 = vmatpush3.msra.mxu1 %v769_v3  ;;  %v939_v3 = vld [vmem:[#allocation4 + $0x1b8] sm:$0xff] }
 0x222   :  { %1110 = vmatpush3.msra.mxu0 %v674_v56  ;;  %1134 = vmatprep.subr.mxu1 %v1313_v5  ;;  %v844_v56 = vld [vmem:[#allocation4 + $0x108] sm:$0xff] }
 0x223   :  { %1111 = vmatprep.subr.mxu0 %v1313_v5  ;;  %1135 = vmatpush3.msra.mxu1 %v768_v4  ;;  %v938_v4 = vld [vmem:[#allocation4 + $0x1b0] sm:$0xff] }
 0x224   :  { %1112 = vmatpush3.msra.mxu0 %v673_v57  ;;  %1136 = vmatprep.subr.mxu1 %v1313_v5  ;;  %v843_v57 = vld [vmem:[#allocation4 + $0x100] sm:$0xff] }
 0x225   :  { %1113 = vmatprep.subr.mxu0 %v1313_v5  ;;  %1137 = vmatpush3.msra.mxu1 %v767_v7  ;;  %v937_v7 = vld [vmem:[#allocation4 + $0x1a8] sm:$0xff] }
 0x226   :  { %1114 = vmatpush3.msra.mxu0 %v672_v58  ;;  %1138 = vmatprep.subr.mxu1 %v1313_v5  ;;  %v947_v58 = vld [vmem:[#allocation4 + $0x1f8] sm:$0xff] }
 0x227   :  { %1115 = vmatprep.subr.mxu0 %v1313_v5  ;;  %1139 = vmatpush3.msra.mxu1 %v766_v9  ;;  %v936_v9 = vld [vmem:[#allocation4 + $0x1a0] sm:$0xff] }
 0x228   :  { %1116 = vmatpush3.msra.mxu0 %v671_v59  ;;  %1140 = vmatprep.subr.mxu1 %v1313_v5  ;;  %v946_v59 = vld [vmem:[#allocation4 + $0x1f0] sm:$0xff] }
 0x229   :  { %1117 = vmatprep.subr.mxu0 %v1313_v5  ;;  %1141 = vmatpush3.msra.mxu1 %v765_v10  ;;  %v935_v10 = vld [vmem:[#allocation4 + $0x198] sm:$0xff] }
 0x22a   :  { %1118 = vmatpush3.msra.mxu0 %v670_v60  ;;  %1142 = vmatprep.subr.mxu1 %v1313_v5  ;;  %v945_v60 = vld [vmem:[#allocation4 + $0x1e8] sm:$0xff] }
 0x22b   :  { %1119 = vmatprep.subr.mxu0 %v1313_v5  ;;  %1143 = vmatpush3.msra.mxu1 %v764_v11  ;;  %v770_v11 = vld [vmem:[%s1478_s3 + $0x4] ss:$0 sm:$0xff] }
 0x22c   :  { %1120 = vmatpush3.msra.mxu0 %v669_v61  ;;  %1144 = vmatprep.subr.mxu1 %v1313_v5  ;;  %v944_v61 = vld [vmem:[#allocation4 + $0x1e0] sm:$0xff] }
 0x22d   :  { %1121 = vmatprep.subr.mxu0 %v1313_v5  ;;  %1145 = vmatpush3.msra.mxu1 %v763_v12 }
 0x22e   :  { %1122 = vmatpush3.msra.mxu0 %v668_v62  ;;  %1146 = vmatprep.subr.mxu1 %v1313_v5  ;;  %v943_v62 = vld [vmem:[#allocation4 + $0x1d8] sm:$0xff] }
 0x22f   :  { %1123 = vmatprep.subr.mxu0 %v1313_v5  ;;  %1147 = vmatpush3.msra.mxu1 %v762_v13 }
 0x230   :  { %1124 = vmatpush3.msra.mxu0 %v667_v63  ;;  %1148 = vmatprep.subr.mxu1 %v1313_v5  ;;  %v942_v63 = vld [vmem:[#allocation4 + $0x1d0] sm:$0xff] }
 0x231   :  { %1125 = vmatprep.subr.mxu0 %v1313_v5  ;;  %1149 = vmatpush3.msra.mxu1 %v761_v14 }
 0x232   :  { %1126 = vmatpush3.msra.mxu0 %v666_v0  ;;  %1150 = vmatprep.subr.mxu1 %v1313_v5  ;;  %v941_v0 = vld [vmem:[#allocation4 + $0x1c8] sm:$0xff] }
 0x233   :  { %1127 = vmatprep.subr.mxu0 %v1313_v5  ;;  %1151 = vmatpush3.msra.mxu1 %v760_v15 }
 0x234   :  { %1128 = vmatpush3.msra.mxu0 %v665_v2  ;;  %1152 = vmatprep.subr.mxu1 %v1313_v5  ;;  %v940_v2 = vld [vmem:[#allocation4 + $0x1c0] sm:$0xff] }
 0x235   :  { %1167 = vmatprep.subr.mxu0 %v1313_v5  ;;  %1153 = vmatpush3.msra.mxu1 %v759_v16  ;;  %v934_v16 = vld [vmem:[#allocation4 + $0x190] sm:$0xff] }
 0x236   :  { %1154 = vmatprep.subr.mxu1 %v1313_v5 }
 0x237   :  { %1155 = vmatpush3.msra.mxu1 %v758_v17  ;;  %v933_v17 = vld [vmem:[#allocation4 + $0x188] sm:$0xff] }
 0x238   :  { %1156 = vmatprep.subr.mxu1 %v1313_v5 }
 0x239   :  { %1157 = vmatpush3.msra.mxu1 %v757_v18  ;;  %v932_v18 = vld [vmem:[#allocation4 + $0x180] sm:$0xff] }
 0x23a   :  { %1158 = vmatprep.subr.mxu1 %v1313_v5 }
 0x23b   :  { %1159 = vmatpush3.msra.mxu1 %v756_v8 }
 0x23c   :  { %1160 = vmatprep.subr.mxu1 %v1313_v5 }
 0x23d   :  { %1161 = vmatpush3.msra.mxu1 %v755_v36 }
 0x23e   :  { %1162 = vmatprep.subr.mxu1 %v1313_v5 }
 0x23f   :  { %1163 = vmatpush3.msra.mxu1 %v754_v37 }
 0x240   :  { %1202 = vmatprep.subr.mxu1 %v1313_v5 }
 0x2df   :  { %v649_v22 = vpop.f32.mrf.mxu1 }
 0x2e0   :  { %v650_v23 = vadd.f32 %v649_v22, %v576_v20 }
 0x2e1   :  { %v651_v24 = vpop.f32.mrf.mxu1 }
 0x2e2   :  { %v654_v25 = vsub.f32 0.0, %v650_v23  ;;  %v652_v26 = vadd.f32 %v651_v24, %v580_v21  ;;  %v948_v24 = vld [vmem:[%s1478_s3 + $0x6] ss:$0 sm:$0xff] }
 0x2e4   :  { %v656_v27 = vmul.f32 1.442695, %v654_v25  ;;  %v655_v28 = vsub.f32 0.0, %v652_v26 }
 0x2e6   :  { %1255 = vpow2.f32 %v656_v27  ;;  %v658_v29 = vmul.f32 1.442695, %v655_v28 }
 0x2e8   :  { %1257 = vpow2.f32 %v658_v29 }
 0x2f3   :  { %v1256_v30 = vpop.eup %1255 }
 0x2f4   :  { %v660_v31 = vadd.f32 1.0, %v1256_v30 }
 0x2f5   :  { %v1258_v32 = vpop.eup %1257 }
 0x2f6   :  { %v661_v33 = vadd.f32 1.0, %v1258_v32  ;;  %1259 = vrcp.f32 %v660_v31 }
 0x2f8   :  { %1261 = vrcp.f32 %v661_v33 }
 0x303   :  { %v1260_v34 = vpop.eup %1259 }
 0x305   :  { %v1262_v6 = vpop.eup %1261 }
 0x306   :  { %v664_v35 = vmul.f32 %v1262_v6, %v1260_v34 }
 0x308   :  { %1130 = vmatmul.mubr.f32.vlgmr.msra.gmra.mxu0 %v664_v35 }
 0x309   :  { %1199 = vmatprep.mubr.msk.f32.mxu0 %vm1314_vm0, %v1313_v5  ;;  %1168 = vmatpush3.msra.mxu0 %v858_v38 }
 0x30a   :  { %1169 = vmatprep.subr.mxu0 %v1313_v5 }
 0x30b   :  { %1170 = vmatpush3.msra.mxu0 %v857_v39 }
 0x30c   :  { %1171 = vmatprep.subr.mxu0 %v1313_v5 }
 0x30d   :  { %1172 = vmatpush3.msra.mxu0 %v856_v40 }
 0x30e   :  { %1173 = vmatprep.subr.mxu0 %v1313_v5 }
 0x30f   :  { %1174 = vmatpush3.msra.mxu0 %v855_v41 }
 0x310   :  { %1175 = vmatprep.subr.mxu0 %v1313_v5 }
 0x311   :  { %1176 = vmatpush3.msra.mxu0 %v854_v42 }
 0x312   :  { %1177 = vmatprep.subr.mxu0 %v1313_v5 }
 0x313   :  { %1178 = vmatpush3.msra.mxu0 %v853_v43 }
 0x314   :  { %1179 = vmatprep.subr.mxu0 %v1313_v5 }
 0x315   :  { %1180 = vmatpush3.msra.mxu0 %v852_v44 }
 0x316   :  { %1181 = vmatprep.subr.mxu0 %v1313_v5 }
 0x317   :  { %1182 = vmatpush3.msra.mxu0 %v851_v45 }
 0x318   :  { %1183 = vmatprep.subr.mxu0 %v1313_v5 }
 0x319   :  { %1184 = vmatpush3.msra.mxu0 %v850_v46 }
 0x31a   :  { %1185 = vmatprep.subr.mxu0 %v1313_v5 }
 0x31b   :  { %1186 = vmatpush3.msra.mxu0 %v849_v47 }
 0x31c   :  { %1187 = vmatprep.subr.mxu0 %v1313_v5 }
 0x31d   :  { %1188 = vmatpush3.msra.mxu0 %v848_v48 }
 0x31e   :  { %1189 = vmatprep.subr.mxu0 %v1313_v5 }
 0x31f   :  { %1190 = vmatpush3.msra.mxu0 %v847_v49 }
 0x320   :  { %1191 = vmatprep.subr.mxu0 %v1313_v5 }
 0x321   :  { %1192 = vmatpush3.msra.mxu0 %v846_v50 }
 0x322   :  { %1193 = vmatprep.subr.mxu0 %v1313_v5 }
 0x323   :  { %1194 = vmatpush3.msra.mxu0 %v845_v55 }
 0x324   :  { %1195 = vmatprep.subr.mxu0 %v1313_v5 }
 0x325   :  { %1196 = vmatpush3.msra.mxu0 %v844_v56 }
 0x326   :  { %1197 = vmatprep.subr.mxu0 %v1313_v5 }
 0x327   :  { %1198 = vmatpush3.msra.mxu0 %v843_v57 }
 0x3c8   :  { %v748_v52 = vpop.f32.mrf.mxu0 }
 0x3c9   :  { %v749_v1 = vadd.f32 %v748_v52, %v681_v51 }
 0x3ca   :  { %v1131_v53 = vpop.f32.mrf.mxu0 }
 0x3cb   :  { %v752_v54 = vmax.f32 %v749_v1, 0.0 }
 0x3cd   :  { %1165 = vmatmul.mubr.f32.vlgmr.msra.gmra.mxu1 %v752_v54 }
 0x3ce   :  { %1234 = vmatprep.mubr.msk.f32.mxu1 %vm1314_vm0, %v1313_v5  ;;  %1203 = vmatpush3.msra.mxu1 %v947_v58 }
 0x3cf   :  { %1204 = vmatprep.subr.mxu1 %v1313_v5 }
 0x3d0   :  { %1205 = vmatpush3.msra.mxu1 %v946_v59 }
 0x3d1   :  { %1206 = vmatprep.subr.mxu1 %v1313_v5 }
 0x3d2   :  { %1207 = vmatpush3.msra.mxu1 %v945_v60 }
 0x3d3   :  { %1208 = vmatprep.subr.mxu1 %v1313_v5 }
 0x3d4   :  { %1209 = vmatpush3.msra.mxu1 %v944_v61 }
 0x3d5   :  { %1210 = vmatprep.subr.mxu1 %v1313_v5 }
 0x3d6   :  { %1211 = vmatpush3.msra.mxu1 %v943_v62 }
 0x3d7   :  { %1212 = vmatprep.subr.mxu1 %v1313_v5 }
 0x3d8   :  { %1213 = vmatpush3.msra.mxu1 %v942_v63 }
 0x3d9   :  { %1214 = vmatprep.subr.mxu1 %v1313_v5 }
 0x3da   :  { %1215 = vmatpush3.msra.mxu1 %v941_v0 }
 0x3db   :  { %1216 = vmatprep.subr.mxu1 %v1313_v5 }
 0x3dc   :  { %1217 = vmatpush3.msra.mxu1 %v940_v2 }
 0x3dd   :  { %1218 = vmatprep.subr.mxu1 %v1313_v5 }
 0x3de   :  { %1219 = vmatpush3.msra.mxu1 %v939_v3 }
 0x3df   :  { %1220 = vmatprep.subr.mxu1 %v1313_v5 }
 0x3e0   :  { %1221 = vmatpush3.msra.mxu1 %v938_v4 }
 0x3e1   :  { %1222 = vmatprep.subr.mxu1 %v1313_v5 }
 0x3e2   :  { %1223 = vmatpush3.msra.mxu1 %v937_v7 }
 0x3e3   :  { %1224 = vmatprep.subr.mxu1 %v1313_v5 }
 0x3e4   :  { %1225 = vmatpush3.msra.mxu1 %v936_v9 }
 0x3e5   :  { %1226 = vmatprep.subr.mxu1 %v1313_v5 }
 0x3e6   :  { %1227 = vmatpush3.msra.mxu1 %v935_v10 }
 0x3e7   :  { %1228 = vmatprep.subr.mxu1 %v1313_v5 }
 0x3e8   :  { %1229 = vmatpush3.msra.mxu1 %v934_v16 }
 0x3e9   :  { %1230 = vmatprep.subr.mxu1 %v1313_v5 }
 0x3ea   :  { %1231 = vmatpush3.msra.mxu1 %v933_v17 }
 0x3eb   :  { %1232 = vmatprep.subr.mxu1 %v1313_v5 }
 0x3ec   :  { %1233 = vmatpush3.msra.mxu1 %v932_v18 }
 0x48d   :  { %v837_v12 = vpop.f32.mrf.mxu1 }
 0x48e   :  { %v838_v13 = vadd.f32 %v837_v12, %v770_v11 }
 0x48f   :  { %v1166_v14 = vpop.f32.mrf.mxu1 }
 0x490   :  { %v841_v15 = vmax.f32 %v838_v13, 0.0 }
 0x492   :  { %1200 = vmatmul.mubr.f32.vlgmr.msra.gmra.mxu0 %v841_v15 }
 0x552   :  { %v926_v20 = vpop.f32.mrf.mxu0 }
 0x553   :  { %v927_v21 = vadd.f32 %v926_v20, %v859_v19 }
 0x554   :  { %v1201_v22 = vpop.f32.mrf.mxu0 }
 0x555   :  { %v930_v23 = vmax.f32 %v927_v21, 0.0 }
 0x557   :  { %1235 = vmatmul.mubr.f32.vlgmr.msra.gmra.mxu1 %v930_v23 }
 0x617   :  { %v1015_v25 = vpop.f32.mrf.mxu1 }
 0x618   :  { %v1016_v26 = vadd.f32 %v1015_v25, %v948_v24 }
 0x619   :  { %v1236_v27 = vpop.f32.mrf.mxu1 }
 0x61a   :  { %1019 = vst [vmem:[%s1479_s4] sm:$0xff] %v1016_v26 }
 0x61b   :  { %1025 = vsyncpa [#allocation3], 1 }
 0x61c   :  { %1026 = vsyncpa [#allocation5], 1 }

</bundles_post_ra>
